<compile_context>
chip_gen: v7x
topology: tpu7x:2x2x1
jax: 0.10.0
libtpu: 0.0.40
codegen_flags: <defaults>
</compile_context>

<pallas_src>
import functools

import jax
import jax.numpy as jnp
from jax.experimental import pallas as pl
from jax.experimental.pallas import tpu as pltpu


# ----------------------------------------------------------------------------
# Pallas kernel: correlation + hm_layer (conv3x3 -> ReLU -> conv3x3), fully
# fused, conv1 folded through the correlation. Processes `bb` batch elements
# per grid step (bb = B on single-TC chips, bb = 1 on 2-TC chips).
# ----------------------------------------------------------------------------
def _locate_hr_kernel(lsf_ref, pf_ref, w1f_ref, b1_ref, mask1_ref, scale2_ref,
                      b2_ref, hm_ref, *, H, W, bb):
    HW = H * W
    # tap index t = ky*3 + kx, spatial offset (dy, dx) = (ky-1, kx-1)
    taps = [(dy, dx) for dy in (-1, 0, 1) for dx in (-1, 0, 1)]

    w1f = w1f_ref[...]                    # (72, h*w) bf16, row = t*8 + out_ch
    b1 = b1_ref[...]                      # (8, 1)   f32
    b2 = b2_ref[...]                      # (1, 1)   f32

    for b in range(bb):                   # static unroll (bb in {1, 2})
        lsf = lsf_ref[b]                  # (C, H*W) bf16, lane-dense (256 lanes)
        pf = pf_ref[b]                    # (C, h*w) bf16

        # ---- fold conv1 weights through the patch features (tiny MXU matmuls)
        # wfold[t*8+o, c] = sum_i w1[o, i, tap_t] * pf[c, i]
        wfold = jax.lax.dot_general(
            w1f, pf, (((1,), (1,)), ((), ())),
            preferred_element_type=jnp.float32)            # (72, C)
        # acc_pre[t*8+o, p] = sum_i w1[o, i, tap_t] * coh[i, p]
        acc_pre = jnp.dot(wfold.astype(jnp.bfloat16), lsf,
                          preferred_element_type=jnp.float32)   # (72, H*W) f32

        # ---- conv1 (64 -> 8, SAME pad): roll + mask ALIGNED (8, HW) slabs
        acc1 = None
        for t, (dy, dx) in enumerate(taps):
            slab = acc_pre[t * 8:(t + 1) * 8, :]           # static, 8-row aligned
            s = dy * W + dx
            if s:
                slab = pltpu.roll(slab, (-s) % HW, axis=1)  # XLU lane rotate
            if dy or dx:                                    # border mask (VPU, f32)
                slab = slab * mask1_ref[pl.ds(t * 8, 8), :]
            acc1 = slab if acc1 is None else acc1 + slab
        acc1 = jnp.maximum(acc1 + b1, 0.0)                  # bias + ReLU (f32)

        # ---- conv2 (8 -> 1, SAME pad): per-tap roll + (mask * w2-weight) scale,
        #      then ONE sublane reduction. No row extracts, no M=1 MXU passes.
        acc2 = None
        for t, (dy, dx) in enumerate(taps):
            s = dy * W + dx
            rolled = pltpu.roll(acc1, (-s) % HW, axis=1) if s else acc1
            term = rolled * scale2_ref[pl.ds(t * 8, 8), :]
            acc2 = term if acc2 is None else acc2 + term
        hm_ref[b] = jnp.sum(acc2, axis=0, keepdims=True) + b2   # (1, H*W) store


def _tensorcores_per_device() -> int:
    """1 for v5e/v6e (single TensorCore), 2 for v7x / v4 / v5p style chips."""
    try:
        kind = jax.devices()[0].device_kind.lower()
    except Exception:
        return 1
    if any(tag in kind for tag in ("v7", "tpu7", "v4", "v5p")):
        return 2
    return 1


def locate_hr_head(lsf, pf, w1, b1, w2, b2):
    """coh = einsum('bcHW,bchw->bhwHW') -> view(B, h*w, H, W) -> hm_layer."""
    B, C, H, W = lsf.shape
    _, Cp, h, w = pf.shape
    assert Cp == C
    hw = h * w
    HW = H * W
    assert w1.shape == (8, hw, 3, 3) and w2.shape == (1, 8, 3, 3)

    # Chip-gated batch strategy (see header): one grid step with B unrolled on
    # single-TC chips, grid=(B,) "parallel" on 2-TC chips.
    bb = B if _tensorcores_per_device() == 1 else 1
    assert B % bb == 0

    # Lane-dense flattening; MXU operands in bf16 (f32 accumulation in-kernel).
    lsf_flat = lsf.reshape(B, C, HW).astype(jnp.bfloat16)
    pf_flat = pf.reshape(B, C, hw).astype(jnp.bfloat16)

    # conv1 weights, tap-major folded layout: w1f[t*8 + o, i] = w1[o, i, ky, kx].
    w1f = jnp.transpose(w1, (2, 3, 0, 1)).reshape(9 * 8, hw).astype(jnp.bfloat16)
    b1r = b1.reshape(8, 1).astype(jnp.float32)
    b2r = b2.reshape(1, 1).astype(jnp.float32)

    # Per-tap SAME-padding border masks, precomputed once in the wrapper
    # (constant index_map -> loaded once, revisited across the grid).
    yy = jnp.arange(HW, dtype=jnp.int32) // W
    xx = jnp.arange(HW, dtype=jnp.int32) % W
    taps = [(dy, dx) for dy in (-1, 0, 1) for dx in (-1, 0, 1)]

    def tap_mask(dy, dx):
        m = jnp.ones((HW,), jnp.float32)
        if dy < 0:
            m = m * (yy >= -dy)
        if dy > 0:
            m = m * (yy < H - dy)
        if dx < 0:
            m = m * (xx >= -dx)
        if dx > 0:
            m = m * (xx < W - dx)
        return m

    masks = jnp.stack([tap_mask(dy, dx) for dy, dx in taps], axis=0)  # (9, HW)
    mask1 = jnp.repeat(masks, 8, axis=0)                              # (72, HW)
    # conv2 scale[t*8 + i, p] = mask_t[p] * w2[0, i, ky, kx]
    w2t = jnp.transpose(w2[0], (1, 2, 0)).reshape(9, 8).astype(jnp.float32)
    scale2 = (masks[:, None, :] * w2t[:, :, None]).reshape(9 * 8, HW)

    kernel = functools.partial(_locate_hr_kernel, H=H, W=W, bb=bb)

    hm_flat = pl.pallas_call(
        kernel,
        out_shape=jax.ShapeDtypeStruct((B, 1, HW), jnp.float32),
        grid_spec=pltpu.PrefetchScalarGridSpec(
            num_scalar_prefetch=0,
            grid=(B // bb,),
            in_specs=[
                pl.BlockSpec((bb, C, HW), lambda i: (i, 0, 0)),   # image feats (bf16)
                pl.BlockSpec((bb, C, hw), lambda i: (i, 0, 0)),   # patch feats (bf16)
                pl.BlockSpec((9 * 8, hw), lambda i: (0, 0)),      # folded conv1 w
                pl.BlockSpec((8, 1), lambda i: (0, 0)),           # conv1 bias
                pl.BlockSpec((9 * 8, HW), lambda i: (0, 0)),      # conv1 tap masks
                pl.BlockSpec((9 * 8, HW), lambda i: (0, 0)),      # conv2 mask*weight
                pl.BlockSpec((1, 1), lambda i: (0, 0)),           # conv2 bias
            ],
            out_specs=pl.BlockSpec((bb, 1, HW), lambda i: (i, 0, 0)),
        ),
        compiler_params=pltpu.CompilerParams(
            dimension_semantics=("parallel",)),
    )(lsf_flat, pf_flat, w1f, b1r, mask1, scale2, b2r)

    return hm_flat.reshape(B, 1, H, W)


# ----------------------------------------------------------------------------
# Stand-in HRNet feature extractor (plain JAX glue, NCHW).
# ----------------------------------------------------------------------------
def stand_in_hrnet(x, params):
    for wgt, bias in params:
        x = jax.lax.conv_general_dilated(
            x, wgt, window_strides=(2, 2), padding="SAME",
            dimension_numbers=("NCHW", "OIHW", "NCHW"))
        x = jax.nn.relu(x + bias[None, :, None, None])
    return x


# ----------------------------------------------------------------------------
# Pure-JAX reference for the sanity check.
# ----------------------------------------------------------------------------
def _conv2d_ref(x, wgt, bias, precision):
    y = jax.lax.conv_general_dilated(
        x, wgt, (1, 1), "SAME",
        dimension_numbers=("NCHW", "OIHW", "NCHW"),
        precision=precision)
    return y + bias[None, :, None, None]


def locate_hr_ref(lsf, pf, w1, b1, w2, b2, precision=jax.lax.Precision.HIGHEST):
    B, C, H, W = lsf.shape
    _, _, h, w = pf.shape
    coh = jnp.einsum("bcHW,bchw->bhwHW", lsf, pf, precision=precision)
    coh = coh.reshape(B, h * w, H, W)
    mid = jax.nn.relu(_conv2d_ref(coh, w1, b1, precision))
    return _conv2d_ref(mid, w2, b2, precision)


if __name__ == "__main__":
    key = jax.random.PRNGKey(0)
    ks = jax.random.split(key, 12)

    B = 2
    PATCH_SIZE = 64            # cfg.TRAIN.PATCH_SIZE
    IMG_SIZE = 128
    C_FEAT = 32                # stand-in HRNet output channels
    hw = (PATCH_SIZE // 8) ** 2  # final_feature_channel = 64

    # Inputs (NCHW, like PyTorch). Scales chosen so features/correlations are
    # O(1): keeps the relative-error check sensitive to real layout/mask bugs.
    image = 0.5 * jax.random.normal(ks[0], (B, 3, IMG_SIZE, IMG_SIZE), jnp.float32)
    patch = 0.5 * jax.random.normal(ks[1], (B, 3, PATCH_SIZE, PATCH_SIZE), jnp.float32)

    # Stand-in HRNet params: 3 -> 16 -> 32 -> C_FEAT, each 3x3 stride 2.
    chans = [3, 16, 32, C_FEAT]
    hr_params = []
    for i in range(3):
        wgt = 0.2 * jax.random.normal(ks[2 + i], (chans[i + 1], chans[i], 3, 3), jnp.float32)
        bias = 0.05 * jax.random.normal(ks[5 + i], (chans[i + 1],), jnp.float32)
        hr_params.append((wgt, bias))

    # hm_layer params (shapes from the module __init__).
    w1 = 0.2 * jax.random.normal(ks[8], (8, hw, 3, 3), jnp.float32)
    b1 = 0.05 * jax.random.normal(ks[9], (8,), jnp.float32)
    w2 = 0.2 * jax.random.normal(ks[10], (1, 8, 3, 3), jnp.float32)
    b2 = 0.05 * jax.random.normal(ks[11], (1,), jnp.float32)

    # Shared backbone applied to both image and patch (as in the module).
    lsf = stand_in_hrnet(image, hr_params)   # (B, C_FEAT, 16, 16)
    pf = stand_in_hrnet(patch, hr_params)    # (B, C_FEAT, 8, 8)

    hm = jax.block_until_ready(locate_hr_head(lsf, pf, w1, b1, w2, b2))
    assert hm.shape == (B, 1, IMG_SIZE // 8, IMG_SIZE // 8)

    # Correctness check: compare against a HIGHEST-precision f32 reference.
    # Tolerance is calibrated by (a) XLA's default-vs-highest matmul gap and
    # (b) a reference run on the SAME bf16-rounded operands the kernel uses
    # (lsf, pf, w1), so the intended bf16/f32-accumulate path cannot trip the
    # check while real roll/mask/layout bugs (O(0.1..1) relative) are caught.
    hm_ref = jax.block_until_ready(
        locate_hr_ref(lsf, pf, w1, b1, w2, b2, precision=jax.lax.Precision.HIGHEST))
    hm_ref_default = jax.block_until_ready(
        locate_hr_ref(lsf, pf, w1, b1, w2, b2, precision=jax.lax.Precision.DEFAULT))
    lsf_q = lsf.astype(jnp.bfloat16).astype(jnp.float32)
    pf_q = pf.astype(jnp.bfloat16).astype(jnp.float32)
    w1_q = w1.astype(jnp.bfloat16).astype(jnp.float32)
    hm_ref_cast = jax.block_until_ready(
        locate_hr_ref(lsf_q, pf_q, w1_q, b1, w2, b2,
                      precision=jax.lax.Precision.HIGHEST))

    denom = float(jnp.max(jnp.abs(hm_ref))) + 1e-6
    err_kernel = float(jnp.max(jnp.abs(hm - hm_ref))) / denom
    err_default = float(jnp.max(jnp.abs(hm_ref_default - hm_ref))) / denom
    err_cast = float(jnp.max(jnp.abs(hm_ref_cast - hm_ref))) / denom
    tol = max(5e-3, 10.0 * max(err_default, err_cast))
    if err_kernel > tol:
        raise AssertionError(
            f"Pallas kernel mismatch vs reference: rel_err={err_kernel} (tol={tol})")

    print("KERNEL_OK")
</pallas_src>

<mosaic_0001>
module attributes {stable_mosaic.version = 11 : i64} {
  func.func @_locate_hr_kernel(%arg0: i32, %arg1: memref<2x32x256xbf16, #tpu.memory_space<vmem>>, %arg2: memref<2x32x64xbf16, #tpu.memory_space<vmem>>, %arg3: memref<72x64xbf16, #tpu.memory_space<vmem>>, %arg4: memref<8x1xf32, #tpu.memory_space<vmem>>, %arg5: memref<72x256xf32, #tpu.memory_space<vmem>>, %arg6: memref<72x256xf32, #tpu.memory_space<vmem>>, %arg7: memref<1x1xf32, #tpu.memory_space<vmem>>, %arg8: memref<2x1x256xf32, #tpu.memory_space<vmem>>) attributes {dimension_semantics = [#tpu.dimension_semantics<parallel>], iteration_bounds = array<i64: 1>, scalar_prefetch = 0 : i64, scratch_operands = 0 : i64, tpu.core_type = #tpu.core_type<tc>, window_params = [{transform_indices = @transform_0, window_bounds = array<i64: 2, 32, 256>}, {transform_indices = @transform_1, window_bounds = array<i64: 2, 32, 64>}, {pipeline_mode = #tpu.pipeline_mode<synchronous>, transform_indices = @transform_2, window_bounds = array<i64: 72, 64>}, {pipeline_mode = #tpu.pipeline_mode<synchronous>, transform_indices = @transform_3, window_bounds = array<i64: 8, 1>}, {pipeline_mode = #tpu.pipeline_mode<synchronous>, transform_indices = @transform_4, window_bounds = array<i64: 72, 256>}, {pipeline_mode = #tpu.pipeline_mode<synchronous>, transform_indices = @transform_5, window_bounds = array<i64: 72, 256>}, {pipeline_mode = #tpu.pipeline_mode<synchronous>, transform_indices = @transform_6, window_bounds = array<i64: 1, 1>}, {transform_indices = @transform_7, window_bounds = array<i64: 2, 1, 256>}]} {
    %c0 = arith.constant 0 : index
    %c0_0 = arith.constant 0 : index
    %0 = vector.load %arg3[%c0, %c0_0] : memref<72x64xbf16, #tpu.memory_space<vmem>>, vector<72x64xbf16>
    %c0_1 = arith.constant 0 : index
    %c0_2 = arith.constant 0 : index
    %1 = vector.load %arg4[%c0_1, %c0_2] : memref<8x1xf32, #tpu.memory_space<vmem>>, vector<8x1xf32>
    %c0_3 = arith.constant 0 : index
    %c0_4 = arith.constant 0 : index
    %2 = vector.load %arg7[%c0_3, %c0_4] : memref<1x1xf32, #tpu.memory_space<vmem>>, vector<1x1xf32>
    %c0_5 = arith.constant 0 : index
    %c0_6 = arith.constant 0 : index
    %c0_7 = arith.constant 0 : index
    %3 = vector.load %arg1[%c0_5, %c0_6, %c0_7] : memref<2x32x256xbf16, #tpu.memory_space<vmem>>, vector<1x32x256xbf16>
    %4 = vector.shape_cast %3 : vector<1x32x256xbf16> to vector<32x256xbf16>
    %c0_8 = arith.constant 0 : index
    %c0_9 = arith.constant 0 : index
    %c0_10 = arith.constant 0 : index
    %5 = vector.load %arg2[%c0_8, %c0_9, %c0_10] : memref<2x32x64xbf16, #tpu.memory_space<vmem>>, vector<1x32x64xbf16>
    %6 = vector.shape_cast %5 : vector<1x32x64xbf16> to vector<32x64xbf16>
    %cst = arith.constant dense<0.000000e+00> : vector<72x32xf32>
    %7 = tpu.matmul %0, %6, %cst {dimension_numbers = #tpu.dot_dimension_numbers<[1], [1], [0], [0], [0, 0, 1, 0], [], []>} : vector<72x64xbf16>, vector<32x64xbf16>, vector<72x32xf32> -> vector<72x32xf32>
    %8 = arith.truncf %7 : vector<72x32xf32> to vector<72x32xbf16>
    %cst_11 = arith.constant dense<0.000000e+00> : vector<72x256xf32>
    %9 = tpu.matmul %8, %4, %cst_11 {dimension_numbers = #tpu.dot_dimension_numbers<[1], [0], [0], [1], [0, 0, 1, 1], [], []>} : vector<72x32xbf16>, vector<32x256xbf16>, vector<72x256xf32> -> vector<72x256xf32>
    %10 = vector.extract_strided_slice %9 {offsets = [0, 0], sizes = [8, 256], strides = [1, 1]} : vector<72x256xf32> to vector<8x256xf32>
    %c17_i32 = arith.constant 17 : i32
    %11 = tpu.dynamic_rotate %10 by %c17_i32 dim 1 : vector<8x256xf32>, i32 -> vector<8x256xf32>
    %c0_12 = arith.constant 0 : index
    %c0_13 = arith.constant 0 : index
    %12 = vector.load %arg5[%c0_12, %c0_13] : memref<72x256xf32, #tpu.memory_space<vmem>>, vector<8x256xf32>
    %13 = arith.mulf %11, %12 : vector<8x256xf32>
    %14 = vector.extract_strided_slice %9 {offsets = [8, 0], sizes = [8, 256], strides = [1, 1]} : vector<72x256xf32> to vector<8x256xf32>
    %c16_i32 = arith.constant 16 : i32
    %15 = tpu.dynamic_rotate %14 by %c16_i32 dim 1 : vector<8x256xf32>, i32 -> vector<8x256xf32>
    %c8 = arith.constant 8 : index
    %c0_14 = arith.constant 0 : index
    %16 = vector.load %arg5[%c8, %c0_14] : memref<72x256xf32, #tpu.memory_space<vmem>>, vector<8x256xf32>
    %17 = arith.mulf %15, %16 : vector<8x256xf32>
    %18 = arith.addf %13, %17 : vector<8x256xf32>
    %19 = vector.extract_strided_slice %9 {offsets = [16, 0], sizes = [8, 256], strides = [1, 1]} : vector<72x256xf32> to vector<8x256xf32>
    %c15_i32 = arith.constant 15 : i32
    %20 = tpu.dynamic_rotate %19 by %c15_i32 dim 1 : vector<8x256xf32>, i32 -> vector<8x256xf32>
    %c16 = arith.constant 16 : index
    %c0_15 = arith.constant 0 : index
    %21 = vector.load %arg5[%c16, %c0_15] : memref<72x256xf32, #tpu.memory_space<vmem>>, vector<8x256xf32>
    %22 = arith.mulf %20, %21 : vector<8x256xf32>
    %23 = arith.addf %18, %22 : vector<8x256xf32>
    %24 = vector.extract_strided_slice %9 {offsets = [24, 0], sizes = [8, 256], strides = [1, 1]} : vector<72x256xf32> to vector<8x256xf32>
    %c1_i32 = arith.constant 1 : i32
    %25 = tpu.dynamic_rotate %24 by %c1_i32 dim 1 : vector<8x256xf32>, i32 -> vector<8x256xf32>
    %c24 = arith.constant 24 : index
    %c0_16 = arith.constant 0 : index
    %26 = vector.load %arg5[%c24, %c0_16] : memref<72x256xf32, #tpu.memory_space<vmem>>, vector<8x256xf32>
    %27 = arith.mulf %25, %26 : vector<8x256xf32>
    %28 = arith.addf %23, %27 : vector<8x256xf32>
    %29 = vector.extract_strided_slice %9 {offsets = [32, 0], sizes = [8, 256], strides = [1, 1]} : vector<72x256xf32> to vector<8x256xf32>
    %30 = arith.addf %28, %29 : vector<8x256xf32>
    %31 = vector.extract_strided_slice %9 {offsets = [40, 0], sizes = [8, 256], strides = [1, 1]} : vector<72x256xf32> to vector<8x256xf32>
    %c255_i32 = arith.constant 255 : i32
    %32 = tpu.dynamic_rotate %31 by %c255_i32 dim 1 : vector<8x256xf32>, i32 -> vector<8x256xf32>
    %c40 = arith.constant 40 : index
    %c0_17 = arith.constant 0 : index
    %33 = vector.load %arg5[%c40, %c0_17] : memref<72x256xf32, #tpu.memory_space<vmem>>, vector<8x256xf32>
    %34 = arith.mulf %32, %33 : vector<8x256xf32>
    %35 = arith.addf %30, %34 : vector<8x256xf32>
    %36 = vector.extract_strided_slice %9 {offsets = [48, 0], sizes = [8, 256], strides = [1, 1]} : vector<72x256xf32> to vector<8x256xf32>
    %c241_i32 = arith.constant 241 : i32
    %37 = tpu.dynamic_rotate %36 by %c241_i32 dim 1 : vector<8x256xf32>, i32 -> vector<8x256xf32>
    %c48 = arith.constant 48 : index
    %c0_18 = arith.constant 0 : index
    %38 = vector.load %arg5[%c48, %c0_18] : memref<72x256xf32, #tpu.memory_space<vmem>>, vector<8x256xf32>
    %39 = arith.mulf %37, %38 : vector<8x256xf32>
    %40 = arith.addf %35, %39 : vector<8x256xf32>
    %41 = vector.extract_strided_slice %9 {offsets = [56, 0], sizes = [8, 256], strides = [1, 1]} : vector<72x256xf32> to vector<8x256xf32>
    %c240_i32 = arith.constant 240 : i32
    %42 = tpu.dynamic_rotate %41 by %c240_i32 dim 1 : vector<8x256xf32>, i32 -> vector<8x256xf32>
    %c56 = arith.constant 56 : index
    %c0_19 = arith.constant 0 : index
    %43 = vector.load %arg5[%c56, %c0_19] : memref<72x256xf32, #tpu.memory_space<vmem>>, vector<8x256xf32>
    %44 = arith.mulf %42, %43 : vector<8x256xf32>
    %45 = arith.addf %40, %44 : vector<8x256xf32>
    %46 = vector.extract_strided_slice %9 {offsets = [64, 0], sizes = [8, 256], strides = [1, 1]} : vector<72x256xf32> to vector<8x256xf32>
    %c239_i32 = arith.constant 239 : i32
    %47 = tpu.dynamic_rotate %46 by %c239_i32 dim 1 : vector<8x256xf32>, i32 -> vector<8x256xf32>
    %c64 = arith.constant 64 : index
    %c0_20 = arith.constant 0 : index
    %48 = vector.load %arg5[%c64, %c0_20] : memref<72x256xf32, #tpu.memory_space<vmem>>, vector<8x256xf32>
    %49 = arith.mulf %47, %48 : vector<8x256xf32>
    %50 = arith.addf %45, %49 : vector<8x256xf32>
    %51 = vector.broadcast %1 : vector<8x1xf32> to vector<8x256xf32>
    %52 = arith.addf %50, %51 : vector<8x256xf32>
    %cst_21 = arith.constant 0.000000e+00 : f32
    %53 = vector.broadcast %cst_21 : f32 to vector<8x256xf32>
    %54 = arith.maximumf %52, %53 : vector<8x256xf32>
    %c17_i32_22 = arith.constant 17 : i32
    %55 = tpu.dynamic_rotate %54 by %c17_i32_22 dim 1 : vector<8x256xf32>, i32 -> vector<8x256xf32>
    %c0_23 = arith.constant 0 : index
    %c0_24 = arith.constant 0 : index
    %56 = vector.load %arg6[%c0_23, %c0_24] : memref<72x256xf32, #tpu.memory_space<vmem>>, vector<8x256xf32>
    %57 = arith.mulf %55, %56 : vector<8x256xf32>
    %c16_i32_25 = arith.constant 16 : i32
    %58 = tpu.dynamic_rotate %54 by %c16_i32_25 dim 1 : vector<8x256xf32>, i32 -> vector<8x256xf32>
    %c8_26 = arith.constant 8 : index
    %c0_27 = arith.constant 0 : index
    %59 = vector.load %arg6[%c8_26, %c0_27] : memref<72x256xf32, #tpu.memory_space<vmem>>, vector<8x256xf32>
    %60 = arith.mulf %58, %59 : vector<8x256xf32>
    %61 = arith.addf %57, %60 : vector<8x256xf32>
    %c15_i32_28 = arith.constant 15 : i32
    %62 = tpu.dynamic_rotate %54 by %c15_i32_28 dim 1 : vector<8x256xf32>, i32 -> vector<8x256xf32>
    %c16_29 = arith.constant 16 : index
    %c0_30 = arith.constant 0 : index
    %63 = vector.load %arg6[%c16_29, %c0_30] : memref<72x256xf32, #tpu.memory_space<vmem>>, vector<8x256xf32>
    %64 = arith.mulf %62, %63 : vector<8x256xf32>
    %65 = arith.addf %61, %64 : vector<8x256xf32>
    %c1_i32_31 = arith.constant 1 : i32
    %66 = tpu.dynamic_rotate %54 by %c1_i32_31 dim 1 : vector<8x256xf32>, i32 -> vector<8x256xf32>
    %c24_32 = arith.constant 24 : index
    %c0_33 = arith.constant 0 : index
    %67 = vector.load %arg6[%c24_32, %c0_33] : memref<72x256xf32, #tpu.memory_space<vmem>>, vector<8x256xf32>
    %68 = arith.mulf %66, %67 : vector<8x256xf32>
    %69 = arith.addf %65, %68 : vector<8x256xf32>
    %c32 = arith.constant 32 : index
    %c0_34 = arith.constant 0 : index
    %70 = vector.load %arg6[%c32, %c0_34] : memref<72x256xf32, #tpu.memory_space<vmem>>, vector<8x256xf32>
    %71 = arith.mulf %54, %70 : vector<8x256xf32>
    %72 = arith.addf %69, %71 : vector<8x256xf32>
    %c255_i32_35 = arith.constant 255 : i32
    %73 = tpu.dynamic_rotate %54 by %c255_i32_35 dim 1 : vector<8x256xf32>, i32 -> vector<8x256xf32>
    %c40_36 = arith.constant 40 : index
    %c0_37 = arith.constant 0 : index
    %74 = vector.load %arg6[%c40_36, %c0_37] : memref<72x256xf32, #tpu.memory_space<vmem>>, vector<8x256xf32>
    %75 = arith.mulf %73, %74 : vector<8x256xf32>
    %76 = arith.addf %72, %75 : vector<8x256xf32>
    %c241_i32_38 = arith.constant 241 : i32
    %77 = tpu.dynamic_rotate %54 by %c241_i32_38 dim 1 : vector<8x256xf32>, i32 -> vector<8x256xf32>
    %c48_39 = arith.constant 48 : index
    %c0_40 = arith.constant 0 : index
    %78 = vector.load %arg6[%c48_39, %c0_40] : memref<72x256xf32, #tpu.memory_space<vmem>>, vector<8x256xf32>
    %79 = arith.mulf %77, %78 : vector<8x256xf32>
    %80 = arith.addf %76, %79 : vector<8x256xf32>
    %c240_i32_41 = arith.constant 240 : i32
    %81 = tpu.dynamic_rotate %54 by %c240_i32_41 dim 1 : vector<8x256xf32>, i32 -> vector<8x256xf32>
    %c56_42 = arith.constant 56 : index
    %c0_43 = arith.constant 0 : index
    %82 = vector.load %arg6[%c56_42, %c0_43] : memref<72x256xf32, #tpu.memory_space<vmem>>, vector<8x256xf32>
    %83 = arith.mulf %81, %82 : vector<8x256xf32>
    %84 = arith.addf %80, %83 : vector<8x256xf32>
    %c239_i32_44 = arith.constant 239 : i32
    %85 = tpu.dynamic_rotate %54 by %c239_i32_44 dim 1 : vector<8x256xf32>, i32 -> vector<8x256xf32>
    %c64_45 = arith.constant 64 : index
    %c0_46 = arith.constant 0 : index
    %86 = vector.load %arg6[%c64_45, %c0_46] : memref<72x256xf32, #tpu.memory_space<vmem>>, vector<8x256xf32>
    %87 = arith.mulf %85, %86 : vector<8x256xf32>
    %88 = arith.addf %84, %87 : vector<8x256xf32>
    %cst_47 = arith.constant dense<0.000000e+00> : vector<256xf32>
    %89 = vector.multi_reduction <add>, %88, %cst_47 [0] : vector<8x256xf32> to vector<256xf32>
    %90 = vector.shape_cast %89 : vector<256xf32> to vector<1x256xf32>
    %91 = vector.broadcast %2 : vector<1x1xf32> to vector<1x256xf32>
    %92 = arith.addf %90, %91 : vector<1x256xf32>
    %c0_48 = arith.constant 0 : index
    %c0_49 = arith.constant 0 : index
    %c0_50 = arith.constant 0 : index
    %93 = vector.load %arg8[%c0_48, %c0_49, %c0_50] : memref<2x1x256xf32, #tpu.memory_space<vmem>>, vector<1x1x256xf32>
    %94 = vector.shape_cast %93 : vector<1x1x256xf32> to vector<1x256xf32>
    %95 = vector.shape_cast %92 : vector<1x256xf32> to vector<1x1x256xf32>
    tpu.vector_store %arg8[%c0_48, %c0_49, %c0_50], %95 {strides = array<i32>} : memref<2x1x256xf32, #tpu.memory_space<vmem>>, vector<1x1x256xf32>,
    %c1 = arith.constant 1 : index
    %c0_51 = arith.constant 0 : index
    %c0_52 = arith.constant 0 : index
    %96 = vector.load %arg1[%c1, %c0_51, %c0_52] : memref<2x32x256xbf16, #tpu.memory_space<vmem>>, vector<1x32x256xbf16>
    %97 = vector.shape_cast %96 : vector<1x32x256xbf16> to vector<32x256xbf16>
    %c1_53 = arith.constant 1 : index
    %c0_54 = arith.constant 0 : index
    %c0_55 = arith.constant 0 : index
    %98 = vector.load %arg2[%c1_53, %c0_54, %c0_55] : memref<2x32x64xbf16, #tpu.memory_space<vmem>>, vector<1x32x64xbf16>
    %99 = vector.shape_cast %98 : vector<1x32x64xbf16> to vector<32x64xbf16>
    %cst_56 = arith.constant dense<0.000000e+00> : vector<72x32xf32>
    %100 = tpu.matmul %0, %99, %cst_56 {dimension_numbers = #tpu.dot_dimension_numbers<[1], [1], [0], [0], [0, 0, 1, 0], [], []>} : vector<72x64xbf16>, vector<32x64xbf16>, vector<72x32xf32> -> vector<72x32xf32>
    %101 = arith.truncf %100 : vector<72x32xf32> to vector<72x32xbf16>
    %cst_57 = arith.constant dense<0.000000e+00> : vector<72x256xf32>
    %102 = tpu.matmul %101, %97, %cst_57 {dimension_numbers = #tpu.dot_dimension_numbers<[1], [0], [0], [1], [0, 0, 1, 1], [], []>} : vector<72x32xbf16>, vector<32x256xbf16>, vector<72x256xf32> -> vector<72x256xf32>
    %103 = vector.extract_strided_slice %102 {offsets = [0, 0], sizes = [8, 256], strides = [1, 1]} : vector<72x256xf32> to vector<8x256xf32>
    %c17_i32_58 = arith.constant 17 : i32
    %104 = tpu.dynamic_rotate %103 by %c17_i32_58 dim 1 : vector<8x256xf32>, i32 -> vector<8x256xf32>
    %c0_59 = arith.constant 0 : index
    %c0_60 = arith.constant 0 : index
    %105 = vector.load %arg5[%c0_59, %c0_60] : memref<72x256xf32, #tpu.memory_space<vmem>>, vector<8x256xf32>
    %106 = arith.mulf %104, %105 : vector<8x256xf32>
    %107 = vector.extract_strided_slice %102 {offsets = [8, 0], sizes = [8, 256], strides = [1, 1]} : vector<72x256xf32> to vector<8x256xf32>
    %c16_i32_61 = arith.constant 16 : i32
    %108 = tpu.dynamic_rotate %107 by %c16_i32_61 dim 1 : vector<8x256xf32>, i32 -> vector<8x256xf32>
    %c8_62 = arith.constant 8 : index
    %c0_63 = arith.constant 0 : index
    %109 = vector.load %arg5[%c8_62, %c0_63] : memref<72x256xf32, #tpu.memory_space<vmem>>, vector<8x256xf32>
    %110 = arith.mulf %108, %109 : vector<8x256xf32>
    %111 = arith.addf %106, %110 : vector<8x256xf32>
    %112 = vector.extract_strided_slice %102 {offsets = [16, 0], sizes = [8, 256], strides = [1, 1]} : vector<72x256xf32> to vector<8x256xf32>
    %c15_i32_64 = arith.constant 15 : i32
    %113 = tpu.dynamic_rotate %112 by %c15_i32_64 dim 1 : vector<8x256xf32>, i32 -> vector<8x256xf32>
    %c16_65 = arith.constant 16 : index
    %c0_66 = arith.constant 0 : index
    %114 = vector.load %arg5[%c16_65, %c0_66] : memref<72x256xf32, #tpu.memory_space<vmem>>, vector<8x256xf32>
    %115 = arith.mulf %113, %114 : vector<8x256xf32>
    %116 = arith.addf %111, %115 : vector<8x256xf32>
    %117 = vector.extract_strided_slice %102 {offsets = [24, 0], sizes = [8, 256], strides = [1, 1]} : vector<72x256xf32> to vector<8x256xf32>
    %c1_i32_67 = arith.constant 1 : i32
    %118 = tpu.dynamic_rotate %117 by %c1_i32_67 dim 1 : vector<8x256xf32>, i32 -> vector<8x256xf32>
    %c24_68 = arith.constant 24 : index
    %c0_69 = arith.constant 0 : index
    %119 = vector.load %arg5[%c24_68, %c0_69] : memref<72x256xf32, #tpu.memory_space<vmem>>, vector<8x256xf32>
    %120 = arith.mulf %118, %119 : vector<8x256xf32>
    %121 = arith.addf %116, %120 : vector<8x256xf32>
    %122 = vector.extract_strided_slice %102 {offsets = [32, 0], sizes = [8, 256], strides = [1, 1]} : vector<72x256xf32> to vector<8x256xf32>
    %123 = arith.addf %121, %122 : vector<8x256xf32>
    %124 = vector.extract_strided_slice %102 {offsets = [40, 0], sizes = [8, 256], strides = [1, 1]} : vector<72x256xf32> to vector<8x256xf32>
    %c255_i32_70 = arith.constant 255 : i32
    %125 = tpu.dynamic_rotate %124 by %c255_i32_70 dim 1 : vector<8x256xf32>, i32 -> vector<8x256xf32>
    %c40_71 = arith.constant 40 : index
    %c0_72 = arith.constant 0 : index
    %126 = vector.load %arg5[%c40_71, %c0_72] : memref<72x256xf32, #tpu.memory_space<vmem>>, vector<8x256xf32>
    %127 = arith.mulf %125, %126 : vector<8x256xf32>
    %128 = arith.addf %123, %127 : vector<8x256xf32>
    %129 = vector.extract_strided_slice %102 {offsets = [48, 0], sizes = [8, 256], strides = [1, 1]} : vector<72x256xf32> to vector<8x256xf32>
    %c241_i32_73 = arith.constant 241 : i32
    %130 = tpu.dynamic_rotate %129 by %c241_i32_73 dim 1 : vector<8x256xf32>, i32 -> vector<8x256xf32>
    %c48_74 = arith.constant 48 : index
    %c0_75 = arith.constant 0 : index
    %131 = vector.load %arg5[%c48_74, %c0_75] : memref<72x256xf32, #tpu.memory_space<vmem>>, vector<8x256xf32>
    %132 = arith.mulf %130, %131 : vector<8x256xf32>
    %133 = arith.addf %128, %132 : vector<8x256xf32>
    %134 = vector.extract_strided_slice %102 {offsets = [56, 0], sizes = [8, 256], strides = [1, 1]} : vector<72x256xf32> to vector<8x256xf32>
    %c240_i32_76 = arith.constant 240 : i32
    %135 = tpu.dynamic_rotate %134 by %c240_i32_76 dim 1 : vector<8x256xf32>, i32 -> vector<8x256xf32>
    %c56_77 = arith.constant 56 : index
    %c0_78 = arith.constant 0 : index
    %136 = vector.load %arg5[%c56_77, %c0_78] : memref<72x256xf32, #tpu.memory_space<vmem>>, vector<8x256xf32>
    %137 = arith.mulf %135, %136 : vector<8x256xf32>
    %138 = arith.addf %133, %137 : vector<8x256xf32>
    %139 = vector.extract_strided_slice %102 {offsets = [64, 0], sizes = [8, 256], strides = [1, 1]} : vector<72x256xf32> to vector<8x256xf32>
    %c239_i32_79 = arith.constant 239 : i32
    %140 = tpu.dynamic_rotate %139 by %c239_i32_79 dim 1 : vector<8x256xf32>, i32 -> vector<8x256xf32>
    %c64_80 = arith.constant 64 : index
    %c0_81 = arith.constant 0 : index
    %141 = vector.load %arg5[%c64_80, %c0_81] : memref<72x256xf32, #tpu.memory_space<vmem>>, vector<8x256xf32>
    %142 = arith.mulf %140, %141 : vector<8x256xf32>
    %143 = arith.addf %138, %142 : vector<8x256xf32>
    %144 = vector.broadcast %1 : vector<8x1xf32> to vector<8x256xf32>
    %145 = arith.addf %143, %144 : vector<8x256xf32>
    %cst_82 = arith.constant 0.000000e+00 : f32
    %146 = vector.broadcast %cst_82 : f32 to vector<8x256xf32>
    %147 = arith.maximumf %145, %146 : vector<8x256xf32>
    %c17_i32_83 = arith.constant 17 : i32
    %148 = tpu.dynamic_rotate %147 by %c17_i32_83 dim 1 : vector<8x256xf32>, i32 -> vector<8x256xf32>
    %c0_84 = arith.constant 0 : index
    %c0_85 = arith.constant 0 : index
    %149 = vector.load %arg6[%c0_84, %c0_85] : memref<72x256xf32, #tpu.memory_space<vmem>>, vector<8x256xf32>
    %150 = arith.mulf %148, %149 : vector<8x256xf32>
    %c16_i32_86 = arith.constant 16 : i32
    %151 = tpu.dynamic_rotate %147 by %c16_i32_86 dim 1 : vector<8x256xf32>, i32 -> vector<8x256xf32>
    %c8_87 = arith.constant 8 : index
    %c0_88 = arith.constant 0 : index
    %152 = vector.load %arg6[%c8_87, %c0_88] : memref<72x256xf32, #tpu.memory_space<vmem>>, vector<8x256xf32>
    %153 = arith.mulf %151, %152 : vector<8x256xf32>
    %154 = arith.addf %150, %153 : vector<8x256xf32>
    %c15_i32_89 = arith.constant 15 : i32
    %155 = tpu.dynamic_rotate %147 by %c15_i32_89 dim 1 : vector<8x256xf32>, i32 -> vector<8x256xf32>
    %c16_90 = arith.constant 16 : index
    %c0_91 = arith.constant 0 : index
    %156 = vector.load %arg6[%c16_90, %c0_91] : memref<72x256xf32, #tpu.memory_space<vmem>>, vector<8x256xf32>
    %157 = arith.mulf %155, %156 : vector<8x256xf32>
    %158 = arith.addf %154, %157 : vector<8x256xf32>
    %c1_i32_92 = arith.constant 1 : i32
    %159 = tpu.dynamic_rotate %147 by %c1_i32_92 dim 1 : vector<8x256xf32>, i32 -> vector<8x256xf32>
    %c24_93 = arith.constant 24 : index
    %c0_94 = arith.constant 0 : index
    %160 = vector.load %arg6[%c24_93, %c0_94] : memref<72x256xf32, #tpu.memory_space<vmem>>, vector<8x256xf32>
    %161 = arith.mulf %159, %160 : vector<8x256xf32>
    %162 = arith.addf %158, %161 : vector<8x256xf32>
    %c32_95 = arith.constant 32 : index
    %c0_96 = arith.constant 0 : index
    %163 = vector.load %arg6[%c32_95, %c0_96] : memref<72x256xf32, #tpu.memory_space<vmem>>, vector<8x256xf32>
    %164 = arith.mulf %147, %163 : vector<8x256xf32>
    %165 = arith.addf %162, %164 : vector<8x256xf32>
    %c255_i32_97 = arith.constant 255 : i32
    %166 = tpu.dynamic_rotate %147 by %c255_i32_97 dim 1 : vector<8x256xf32>, i32 -> vector<8x256xf32>
    %c40_98 = arith.constant 40 : index
    %c0_99 = arith.constant 0 : index
    %167 = vector.load %arg6[%c40_98, %c0_99] : memref<72x256xf32, #tpu.memory_space<vmem>>, vector<8x256xf32>
    %168 = arith.mulf %166, %167 : vector<8x256xf32>
    %169 = arith.addf %165, %168 : vector<8x256xf32>
    %c241_i32_100 = arith.constant 241 : i32
    %170 = tpu.dynamic_rotate %147 by %c241_i32_100 dim 1 : vector<8x256xf32>, i32 -> vector<8x256xf32>
    %c48_101 = arith.constant 48 : index
    %c0_102 = arith.constant 0 : index
    %171 = vector.load %arg6[%c48_101, %c0_102] : memref<72x256xf32, #tpu.memory_space<vmem>>, vector<8x256xf32>
    %172 = arith.mulf %170, %171 : vector<8x256xf32>
    %173 = arith.addf %169, %172 : vector<8x256xf32>
    %c240_i32_103 = arith.constant 240 : i32
    %174 = tpu.dynamic_rotate %147 by %c240_i32_103 dim 1 : vector<8x256xf32>, i32 -> vector<8x256xf32>
    %c56_104 = arith.constant 56 : index
    %c0_105 = arith.constant 0 : index
    %175 = vector.load %arg6[%c56_104, %c0_105] : memref<72x256xf32, #tpu.memory_space<vmem>>, vector<8x256xf32>
    %176 = arith.mulf %174, %175 : vector<8x256xf32>
    %177 = arith.addf %173, %176 : vector<8x256xf32>
    %c239_i32_106 = arith.constant 239 : i32
    %178 = tpu.dynamic_rotate %147 by %c239_i32_106 dim 1 : vector<8x256xf32>, i32 -> vector<8x256xf32>
    %c64_107 = arith.constant 64 : index
    %c0_108 = arith.constant 0 : index
    %179 = vector.load %arg6[%c64_107, %c0_108] : memref<72x256xf32, #tpu.memory_space<vmem>>, vector<8x256xf32>
    %180 = arith.mulf %178, %179 : vector<8x256xf32>
    %181 = arith.addf %177, %180 : vector<8x256xf32>
    %cst_109 = arith.constant dense<0.000000e+00> : vector<256xf32>
    %182 = vector.multi_reduction <add>, %181, %cst_109 [0] : vector<8x256xf32> to vector<256xf32>
    %183 = vector.shape_cast %182 : vector<256xf32> to vector<1x256xf32>
    %184 = vector.broadcast %2 : vector<1x1xf32> to vector<1x256xf32>
    %185 = arith.addf %183, %184 : vector<1x256xf32>
    %c1_110 = arith.constant 1 : index
    %c0_111 = arith.constant 0 : index
    %c0_112 = arith.constant 0 : index
    %186 = vector.load %arg8[%c1_110, %c0_111, %c0_112] : memref<2x1x256xf32, #tpu.memory_space<vmem>>, vector<1x1x256xf32>
    %187 = vector.shape_cast %186 : vector<1x1x256xf32> to vector<1x256xf32>
    %188 = vector.shape_cast %185 : vector<1x256xf32> to vector<1x1x256xf32>
    tpu.vector_store %arg8[%c1_110, %c0_111, %c0_112], %188 {strides = array<i32>} : memref<2x1x256xf32, #tpu.memory_space<vmem>>, vector<1x1x256xf32>,
    return
  }
  func.func @transform_0(%arg0: i32) -> (i32, i32, i32) {
    %c0_i32 = arith.constant 0 : i32
    %c0_i32_0 = arith.constant 0 : i32
    %c0_i32_1 = arith.constant 0 : i32
    return %arg0, %c0_i32, %c0_i32_0 : i32, i32, i32
  }
  func.func @transform_1(%arg0: i32) -> (i32, i32, i32) {
    %c0_i32 = arith.constant 0 : i32
    %c0_i32_0 = arith.constant 0 : i32
    %c0_i32_1 = arith.constant 0 : i32
    return %arg0, %c0_i32, %c0_i32_0 : i32, i32, i32
  }
  func.func @transform_2(%arg0: i32) -> (i32, i32) {
    %c0_i32 = arith.constant 0 : i32
    %c0_i32_0 = arith.constant 0 : i32
    %c0_i32_1 = arith.constant 0 : i32
    return %c0_i32, %c0_i32_0 : i32, i32
  }
  func.func @transform_3(%arg0: i32) -> (i32, i32) {
    %c0_i32 = arith.constant 0 : i32
    %c0_i32_0 = arith.constant 0 : i32
    %c0_i32_1 = arith.constant 0 : i32
    return %c0_i32, %c0_i32_0 : i32, i32
  }
  func.func @transform_4(%arg0: i32) -> (i32, i32) {
    %c0_i32 = arith.constant 0 : i32
    %c0_i32_0 = arith.constant 0 : i32
    %c0_i32_1 = arith.constant 0 : i32
    return %c0_i32, %c0_i32_0 : i32, i32
  }
  func.func @transform_5(%arg0: i32) -> (i32, i32) {
    %c0_i32 = arith.constant 0 : i32
    %c0_i32_0 = arith.constant 0 : i32
    %c0_i32_1 = arith.constant 0 : i32
    return %c0_i32, %c0_i32_0 : i32, i32
  }
  func.func @transform_6(%arg0: i32) -> (i32, i32) {
    %c0_i32 = arith.constant 0 : i32
    %c0_i32_0 = arith.constant 0 : i32
    %c0_i32_1 = arith.constant 0 : i32
    return %c0_i32, %c0_i32_0 : i32, i32
  }
  func.func @transform_7(%arg0: i32) -> (i32, i32, i32) {
    %c0_i32 = arith.constant 0 : i32
    %c0_i32_0 = arith.constant 0 : i32
    %c0_i32_1 = arith.constant 0 : i32
    return %arg0, %c0_i32, %c0_i32_0 : i32, i32, i32
  }
}

</mosaic_0001>

<bundles_post_ra>
// kernel: tpu_custom_call.1
= control target key start
LH: loop header
LB: loop body
LE: loop exit
PB: predicated region body
PF: predicated region fallthrough
CT: control target
= control target key end

     0   :  { %s1945_s0 = inlined_call_operand.vmem [shape: bf16[2,32,256], index: 0, kind: input, shape index: {}]   ;;  %s1946_s1 = inlined_call_operand.hbm [shape: bf16[2,32,64], index: 1, kind: input, shape index: {}]   ;;  %s1947_s2 = inlined_call_operand.vmem [shape: bf16[72,64], index: 2, kind: input, shape index: {}]   ;;  %s1948_s3 = inlined_call_operand.vmem [shape: f32[8,1], index: 3, kind: input, shape index: {}]   ;;  %s1949_s4 = inlined_call_operand.hbm [shape: f32[72,256], index: 4, kind: input, shape index: {}]   ;;  %s1950_s5 = inlined_call_operand.hbm [shape: f32[72,256], index: 5, kind: input, shape index: {}]   ;;  %s1951_s6 = inlined_call_operand.<no memory space> [shape: f32[1,1], index: 6, kind: input, shape index: {}]   ;;  %s1952_s7 = inlined_call_operand.hbm [shape: f32[2,1,256], index: 7, kind: output, shape index: {}]  }
   0x1   :  { %v12_v0 = vstv %s1951_s6 }
   0x2   :  { %13 = vst [vmem:[#allocation2] sm:$0x1] %v12_v0 }
   0x3   :  { %14 = vsyncpa [#allocation4], 0 }
   0x4   :  { %15 = vsyncpa [#allocation7], 0 }
   0x5   :  { %16 = vsyncpa [#allocation5], 0  ;;  %s1311_s26 = smov [#allocation6]   ;;  %s1217_s30 = scalar_lea.hbm %s1949_s4, 2304 }
   0x6   :  { %s40_s27 = sshll.u32 %s1311_s26, 4  ;;  %p1218_p0 = scmp.ne.s32.totalorder %s1949_s4, %s1217_s30  ;;  %s41_s27 = int_to_ptr.vmem [resolvable:$true] %s40_s27 }
   0x7   :  { %p1221_p1 = scmp.lt.u32.totalorder %s1217_s30, %s1949_s4 }
   0x9   :  { %p1223_p2 = pnand %p1221_p1, %p1218_p0 }
   0xb   :  { %1226 = shalt.err (!%p1223_p2)
}
   0xc   :  { %s1227_s6 = scalar_lea.vmem %s41_s27, 2304  ;;  %p1232_p4 = scmp.lt.s32.totalorder %s41_s27, %s41_s27 }
   0xd   :  { %p1228_p3 = scmp.ne.s32.totalorder %s41_s27, %s1227_s6  ;;  %p1233_p5 = scmp.lt.s32.totalorder %s1227_s6, %s1227_s6 }
   0xf   :  { %p1234_p6 = por %p1233_p5, %p1232_p4 }
  0x11   :  { %p1235_p7 = pnand %p1234_p6, %p1228_p3 }
  0x13   :  { %1238 = shalt.err (!%p1235_p7)
}
  0x14   :  { %s1312_s12 = smov 256   ;;  %s1313_s13 = smov 16  }
  0x15   :  { %46 = dma.hbm_to_vmem [thread:$0]  %s1949_s4, 2304, %s41_s27, [#allocation7], %s1312_s12, %s1312_s12, %s1313_s13  }
  0x16   :  { %s1314_s16 = smov [#allocation3]   ;;  %s1239_s20 = scalar_lea.hbm %s1946_s1, 512 }
  0x17   :  { %s24_s17 = sshll.u32 %s1314_s16, 4  ;;  %p1240_p8 = scmp.ne.s32.totalorder %s1946_s1, %s1239_s20  ;;  %s25_s17 = int_to_ptr.vmem [resolvable:$true] %s24_s17 }
  0x18   :  { %p1243_p9 = scmp.lt.u32.totalorder %s1239_s20, %s1946_s1 }
  0x1a   :  { %p1245_p10 = pnand %p1243_p9, %p1240_p8 }
  0x1c   :  { %1248 = shalt.err (!%p1245_p10)
}
  0x1d   :  { %s1249_s25 = scalar_lea.vmem %s25_s17, 512  ;;  %p1254_p12 = scmp.lt.s32.totalorder %s25_s17, %s25_s17 }
  0x1e   :  { %p1250_p11 = scmp.ne.s32.totalorder %s25_s17, %s1249_s25  ;;  %p1255_p13 = scmp.lt.s32.totalorder %s1249_s25, %s1249_s25 }
  0x20   :  { %p1256_p0 = por %p1255_p13, %p1254_p12 }
  0x22   :  { %p1257_p1 = pnand %p1256_p0, %p1250_p11 }
  0x24   :  { %1260 = shalt.err (!%p1257_p1)
}
  0x25   :  { %s1315_s4 = smov 64   ;;  %s1316_s26 = smov 4  }
  0x26   :  { %30 = dma.hbm_to_vmem [thread:$0]  %s1946_s1, 512, %s25_s17, [#allocation4], %s1315_s4, %s1315_s4, %s1316_s26  }
  0x27   :  { %s1317_s29 = smov [#allocation8]   ;;  %s1261_s10 = scalar_lea.hbm %s1950_s5, 2304 }
  0x28   :  { %s52_s30 = sshll.u32 %s1317_s29, 4  ;;  %p1262_p2 = scmp.ne.s32.totalorder %s1950_s5, %s1261_s10  ;;  %s53_s30 = int_to_ptr.vmem [resolvable:$true] %s52_s30 }
  0x29   :  { %p1265_p3 = scmp.lt.u32.totalorder %s1261_s10, %s1950_s5 }
  0x2b   :  { %p1267_p4 = pnand %p1265_p3, %p1262_p2 }
  0x2d   :  { %1270 = shalt.err (!%p1267_p4)
}
  0x2e   :  { %s1271_s16 = scalar_lea.vmem %s53_s30, 2304  ;;  %p1276_p6 = scmp.lt.s32.totalorder %s53_s30, %s53_s30 }
  0x2f   :  { %p1272_p5 = scmp.ne.s32.totalorder %s53_s30, %s1271_s16  ;;  %p1277_p7 = scmp.lt.s32.totalorder %s1271_s16, %s1271_s16 }
  0x31   :  { %p1278_p8 = por %p1277_p7, %p1276_p6 }
  0x33   :  { %p1279_p9 = pnand %p1278_p8, %p1272_p5 }
  0x35   :  { %1282 = shalt.err (!%p1279_p9)
}
  0x36   :  { %58 = dma.hbm_to_vmem [thread:$0]  %s1950_s5, 2304, %s53_s30, [#allocation7], %s1312_s12, %s1312_s12, %s1313_s13  }
  0x37   :  { %1305 = dma.done.wait [#allocation4], 512  }
  0x38   :  { %1306 = vsyncadd [#allocation4], 4294966784 }
  0x39   :  { %1307 = dma.done.wait [#allocation7], 4608  }
  0x3a   :  { %1308 = vsyncadd [#allocation7], 4294962688  ;;  %v1318_v1 = vmov 0.0   ;;  %vm1319_vm0 = vmmov 0   ;;  %vm123_vm1 = vcmask 523264   ;;  %v1196_v2 = vld [vmem:[#allocation3] sm:$0xff]  }
  0x3b   :  { %1126 = vmatprep.subr.bf16.mxu0 %v1318_v1  ;;  %1130 = vmatprep.mubr.msk.bf16.mxu0 %vm1319_vm0, %v1318_v1  ;;  %v140_v3 = vsel %vm123_vm1, %v1196_v2, 0  ;;  %v1197_v4 = vld [vmem:[#allocation3 + $0x8] sm:$0xff]   ;;  %v1206_v8 = vld [vmem:[%s1945_s0 + $0x14] ss:$8 sps:$4 sm:$0xff]   ;;  %v1438_v10 = vld [vmem:[%s1947_s2] sm:$0xff]   ;;  %v1320_v15 = vmov 0  }
  0x3c   :  { %1127 = vmatpush3.bf16.xpose.msra.mxu0 %v140_v3  ;;  %v1203_v5 = vld [vmem:[%s1945_s0 + $0x4] ss:$8 sps:$4 sm:$0xff]   ;;  %v1205_v6 = vld [vmem:[%s1945_s0] ss:$8 sps:$4 sm:$0xff]   ;;  %v143_v7 = vsel %vm123_vm1, %v1197_v4, 0  ;;  %v1200_v12 = vld [vmem:[%s1947_s2 + $0x10] sm:$0xff]   ;;  %290 = vmatprep.mubr.bf16.mxu1 %v1320_v15 }
  0x3d   :  { %1128 = vmatprep.subr.bf16.mxu0 %v1318_v1  ;;  %258 = vmatprep.subr.bf16.mxu1 %v1203_v5  ;;  %v1208_v9 = vld [vmem:[%s1945_s0 + $0x10] ss:$8 sps:$4 sm:$0xff]   ;;  %v1199_v11 = vld [vmem:[%s1947_s2 + $0x8] sm:$0xff]   ;;  %v1202_v14 = vld [vmem:[%s1947_s2 + $0x20] ss:$0 sps:$4 sm:$0xff]   ;;  %vm242_vm2 = vcmask 261120  }
  0x3e   :  { %259 = vmatpush1.bf16.msra.mxu1 %v1205_v6  ;;  %v1201_v13 = vld [vmem:[%s1947_s2 + $0x18] sm:$0xff]   ;;  %1195 = vset.pattern.permute.xlu0 %v1320_v15  ;;  %v80_v16 = vld [vmem:[%s1948_s3] sm:$0xff]  ;;  %s1321_s5 = smov 17   ;;  %s1322_s12 = smov 15  }
  0x3f   :  { %260 = vmatprep.subr.bf16.mxu1 %v1206_v8  ;;  %447 = vperm.xlu0 %1195, %v80_v16   ;;  %v1209_v17 = vld [vmem:[#allocation3 + $0x10] sm:$0xff]   ;;  %v1210_v24 = vld [vmem:[#allocation3 + $0x18] sm:$0xff]   ;;  %v1213_v47 = vld [vmem:[%s1945_s0 + $0x24] ss:$8 sps:$4 sm:$0xff]   ;;  %s1324_s18 = smov 127   ;;  %s1325_s19 = smov 113  }
  0x40   :  { %v621_v23 = vsel %vm123_vm1, %v1209_v17, 0  ;;  %v624_v30 = vsel %vm123_vm1, %v1210_v24, 0  ;;  %v1211_v46 = vld [vmem:[%s1945_s0 + $0x20] ss:$8 sps:$4 sm:$0xff]   ;;  %v1214_v48 = vld [vmem:[%s1945_s0 + $0x30] ss:$8 sps:$4 sm:$0xff]  }
  0x41   :  { %v1216_v49 = vld [vmem:[%s1945_s0 + $0x34] ss:$8 sps:$4 sm:$0xff]   ;;  %s1323_s0 = smov 1   ;;  %s1326_s20 = smov 112  }
  0x42   :  { %261 = vmatpush1.bf16.msra.mxu1 %v1208_v9  ;;  %s1327_s21 = smov 111  }
  0x43   :  { %1150 = vmatprep.subr.bf16.mxu1 %v1318_v1 }
  0x44   :  { %1129 = vmatpush3.bf16.xpose.msra.mxu0 %v143_v7 }
  0x45   :  { %738 = vmatprep.subr.bf16.mxu0 %v1213_v47 }
  0x4b   :  { %1131 = vmatmul.mubr.msk.bf16.vlgmr.msra.gmra.mrb[0].mxu0 %vm123_vm1, %v1438_v10 }
  0x4c   :  { %1134 = vmatprep.mubr.msk.bf16.mxu0 %vm1319_vm0, %v1318_v1  ;;  %739 = vmatpush1.bf16.msra.mxu0 %v1211_v46  ;;  %v1555_v46 = vld [vmem:[#allocation6 + $0x10] sm:$0xff] }
  0x4d   :  { %740 = vmatprep.subr.bf16.mxu0 %v1216_v49 }
  0x50   :  { %741 = vmatpush1.bf16.msra.mxu0 %v1214_v48 }
  0x53   :  { %1135 = vmatmul.mubr.msk.bf16.gmra.mrb[4].mxu0 %vm123_vm1, %v1199_v11 }
  0x54   :  { %1138 = vmatprep.mubr.msk.bf16.mxu0 %vm1319_vm0, %v1318_v1 }
  0x5b   :  { %1139 = vmatmul.mubr.msk.bf16.gmra.mrb[8].mxu0 %vm123_vm1, %v1200_v12 }
  0x5c   :  { %1142 = vmatprep.mubr.msk.bf16.mxu0 %vm1319_vm0, %v1318_v1 }
  0x63   :  { %1143 = vmatmul.mubr.msk.bf16.gmra.mrb[12].mxu0 %vm123_vm1, %v1201_v13 }
  0x64   :  { %1146 = vmatprep.mubr.msk.bf16.mxu0 %vm1319_vm0, %v1318_v1 }
  0x6b   :  { %1147 = vmatmul.mubr.msk.bf16.gmra.mrb[16].mxu0 %vm123_vm1, %v1202_v14 }
  0x6c   :  { %770 = vmatprep.mubr.bf16.mxu0 %v1320_v15 }
 0x11e   :  { %v179_v18 = vpop.f32.mrb[0].mxu0 }
 0x11f   :  { %v1132_v19 = vpop.f32.mrb[1].mxu0 }
 0x120   :  { %v182_v20 = vpop.f32.mrb[2].mxu0 }
 0x121   :  { %v217_v21 = vpack.c.bf16 %v182_v20, %v179_v18  ;;  %v1133_v22 = vpop.f32.mrb[3].mxu0 }
 0x123   :  { %1087 = vmatmul.mubr.msk.bf16.vlgmr.msra.gmra.mrb[0].mxu1 %vm242_vm2, %v217_v21 }
 0x124   :  { %1151 = vmatpush3.bf16.xpose.msra.mxu1 %v621_v23  ;;  %300 = vmatprep.mubr.bf16.mxu1 %v1320_v15 }
 0x125   :  { %1152 = vmatprep.subr.bf16.mxu1 %v1318_v1 }
 0x126   :  { %v187_v25 = vpop.f32.mrb[4].mxu0 }
 0x127   :  { %v1136_v26 = vpop.f32.mrb[5].mxu0 }
 0x128   :  { %v190_v27 = vpop.f32.mrb[6].mxu0 }
 0x129   :  { %v218_v28 = vpack.c.bf16 %v190_v27, %v187_v25  ;;  %v1137_v29 = vpop.f32.mrb[7].mxu0 }
 0x12b   :  { %1088 = vmatmul.mubr.msk.bf16.gmra.mrb[4].mxu1 %vm242_vm2, %v218_v28 }
 0x12c   :  { %310 = vmatprep.mubr.bf16.mxu1 %v1320_v15  ;;  %1153 = vmatpush3.bf16.xpose.msra.mxu1 %v624_v30 }
 0x12e   :  { %v195_v31 = vpop.f32.mrb[8].mxu0 }
 0x12f   :  { %v1140_v32 = vpop.f32.mrb[9].mxu0 }
 0x130   :  { %v198_v33 = vpop.f32.mrb[10].mxu0  ;;  %v1542_v32 = vpop.permute.xlu0 %447 }
 0x131   :  { %v219_v34 = vpack.c.bf16 %v198_v33, %v195_v31  ;;  %v1141_v35 = vpop.f32.mrb[11].mxu0 }
 0x133   :  { %1089 = vmatmul.mubr.msk.bf16.gmra.mrb[8].mxu1 %vm242_vm2, %v219_v34 }
 0x134   :  { %320 = vmatprep.mubr.bf16.mxu1 %v1320_v15 }
 0x136   :  { %v203_v36 = vpop.f32.mrb[12].mxu0 }
 0x137   :  { %v1144_v37 = vpop.f32.mrb[13].mxu0 }
 0x138   :  { %v206_v38 = vpop.f32.mrb[14].mxu0 }
 0x139   :  { %v220_v39 = vpack.c.bf16 %v206_v38, %v203_v36  ;;  %v1145_v40 = vpop.f32.mrb[15].mxu0 }
 0x13b   :  { %1090 = vmatmul.mubr.msk.bf16.gmra.mrb[12].mxu1 %vm242_vm2, %v220_v39  ;;  %v343_v39 = vlaneseq }
 0x13c   :  { %330 = vmatprep.mubr.bf16.mxu1 %v1320_v15 }
 0x13d   :  { %vm597_vm11 = vcmp.lt.s32.totalorder %v343_v39, 256 }
 0x13e   :  { %v211_v41 = vpop.f32.mrb[16].mxu0 }
 0x13f   :  { %v221_v42 = vpack.c.bf16 %v211_v41, %v211_v41  ;;  %v1148_v43 = vpop.f32.mrb[17].mxu0 }
 0x140   :  { %v214_v44 = vpop.f32.mrb[18].mxu0 }
 0x141   :  { %v1149_v45 = vpop.f32.mrb[19].mxu0 }
 0x143   :  { %1091 = vmatmul.mubr.msk.bf16.gmra.mrb[16].mxu1 %vm242_vm2, %v221_v42 }
 0x144   :  { %1154 = vmatprep.mubr.msk.bf16.mxu1 %vm1319_vm0, %v1318_v1 }
 0x14b   :  { %1155 = vmatmul.mubr.msk.bf16.vlgmr.msra.gmra.mrb[20].mxu1 %vm123_vm1, %v1438_v10 }
 0x14c   :  { %1158 = vmatprep.mubr.msk.bf16.mxu1 %vm1319_vm0, %v1318_v1 }
 0x153   :  { %1159 = vmatmul.mubr.msk.bf16.gmra.mrb[24].mxu1 %vm123_vm1, %v1199_v11 }
 0x154   :  { %1162 = vmatprep.mubr.msk.bf16.mxu1 %vm1319_vm0, %v1318_v1 }
 0x15b   :  { %1163 = vmatmul.mubr.msk.bf16.gmra.mrb[28].mxu1 %vm123_vm1, %v1200_v12 }
 0x15c   :  { %1166 = vmatprep.mubr.msk.bf16.mxu1 %vm1319_vm0, %v1318_v1 }
 0x163   :  { %1167 = vmatmul.mubr.msk.bf16.gmra.mrb[32].mxu1 %vm123_vm1, %v1201_v13 }
 0x164   :  { %1170 = vmatprep.mubr.msk.bf16.mxu1 %vm1319_vm0, %v1318_v1 }
 0x16b   :  { %1171 = vmatmul.mubr.msk.bf16.gmra.mrb[36].mxu1 %vm123_vm1, %v1202_v14 }
 0x1f6   :  { %v292_v50 = vpop.f32.mrb[0].mxu1 }
 0x1f7   :  { %339 = vrot.lane.b32.xlu0 %v292_v50, %s1321_s5  ;;  %v294_v51 = vpop.f32.mrb[1].mxu1  ;;  %v1561_v50 = vld [vmem:[#allocation6] sm:$0xff] }
 0x1f8   :  { %v296_v52 = vpop.f32.mrb[2].mxu1 }
 0x1f9   :  { %352 = vrot.lane.b32.xlu1 %v296_v52, %s1313_s13  ;;  %v298_v53 = vpop.f32.mrb[3].mxu1  ;;  %v1565_v52 = vld [vmem:[#allocation6 + $0x20] sm:$0xff] }
 0x1fb   :  { %341 = vrot.lane.b32.xlu0 %v294_v51, %s1321_s5 }
 0x1fd   :  { %354 = vrot.lane.b32.xlu1 %v298_v53, %s1313_s13 }
 0x1fe   :  { %v302_v54 = vpop.f32.mrb[4].mxu1 }
 0x1ff   :  { %365 = vrot.lane.b32.xlu0 %v302_v54, %s1322_s12  ;;  %v304_v55 = vpop.f32.mrb[5].mxu1 }
 0x200   :  { %v306_v56 = vpop.f32.mrb[6].mxu1 }
 0x201   :  { %367 = vrot.lane.b32.xlu1 %v304_v55, %s1322_s12  ;;  %v308_v57 = vpop.f32.mrb[7].mxu1 }
 0x203   :  { %378 = vrot.lane.b32.xlu0 %v306_v56, %s1323_s0 }
 0x205   :  { %380 = vrot.lane.b32.xlu1 %v308_v57, %s1323_s0  ;;  %v1575_v57 = vld [vmem:[#allocation6 + $0x30] sm:$0xff] }
 0x206   :  { %v1521_v58 = vpop.f32.mrb[8].mxu1 }
 0x207   :  { %v1523_v59 = vpop.f32.mrb[9].mxu1 }
 0x208   :  { %v316_v60 = vpop.f32.mrb[10].mxu1 }
 0x209   :  { %393 = vrot.lane.b32.xlu0 %v316_v60, %s1324_s18  ;;  %v318_v61 = vpop.f32.mrb[11].mxu1 }
 0x20a   :  { %395 = vrot.lane.b32.xlu1 %v318_v61, %s1324_s18 }
 0x20e   :  { %v322_v62 = vpop.f32.mrb[12].mxu1 }
 0x20f   :  { %406 = vrot.lane.b32.xlu0 %v322_v62, %s1325_s19  ;;  %v324_v63 = vpop.f32.mrb[13].mxu1  ;;  %v1581_v62 = vld [vmem:[#allocation6 + $0x18] sm:$0xff] }
 0x210   :  { %408 = vrot.lane.b32.xlu1 %v324_v63, %s1325_s19  ;;  %v326_v0 = vpop.f32.mrb[14].mxu1 }
 0x211   :  { %v328_v1 = vpop.f32.mrb[15].mxu1 }
 0x213   :  { %419 = vrot.lane.b32.xlu0 %v326_v0, %s1326_s20 }
 0x214   :  { %421 = vrot.lane.b32.xlu1 %v328_v1, %s1326_s20 }
 0x216   :  { %v332_v2 = vpop.f32.mrb[16].mxu1 }
 0x217   :  { %432 = vrot.lane.b32.xlu0 %v332_v2, %s1327_s21  ;;  %v334_v3 = vpop.f32.mrb[17].mxu1  ;;  %v1586_v2 = vld [vmem:[#allocation6 + $0x8] sm:$0xff] }
 0x218   :  { %434 = vrot.lane.b32.xlu1 %v334_v3, %s1327_s21  ;;  %v336_v4 = vpop.f32.mrb[18].mxu1 }
 0x219   :  { %v337_v5 = vpop.f32.mrb[19].mxu1 }
 0x21a   :  { %v1590_v5 = vld [vmem:[#allocation6 + $0x28] sm:$0xff] }
 0x21e   :  { %v660_v6 = vpop.f32.mrb[20].mxu1 }
 0x21f   :  { %v1156_v7 = vpop.f32.mrb[21].mxu1 }
 0x220   :  { %v663_v8 = vpop.f32.mrb[22].mxu1 }
 0x221   :  { %v698_v9 = vpack.c.bf16 %v663_v8, %v660_v6  ;;  %v1157_v10 = vpop.f32.mrb[23].mxu1 }
 0x223   :  { %1107 = vmatmul.mubr.msk.bf16.vlgmr.msra.gmra.mrb[20].mxu0 %vm242_vm2, %v698_v9 }
 0x224   :  { %780 = vmatprep.mubr.bf16.mxu0 %v1320_v15 }
 0x226   :  { %v668_v11 = vpop.f32.mrb[24].mxu1 }
 0x227   :  { %v1160_v12 = vpop.f32.mrb[25].mxu1 }
 0x228   :  { %v671_v13 = vpop.f32.mrb[26].mxu1 }
 0x229   :  { %v699_v14 = vpack.c.bf16 %v671_v13, %v668_v11  ;;  %v1161_v16 = vpop.f32.mrb[27].mxu1  ;;  %v1598_v13 = vld [vmem:[#allocation6 + $0x38] sm:$0xff] }
 0x22b   :  { %1108 = vmatmul.mubr.msk.bf16.gmra.mrb[24].mxu0 %vm242_vm2, %v699_v14 }
 0x22c   :  { %790 = vmatprep.mubr.bf16.mxu0 %v1320_v15 }
 0x22e   :  { %v676_v17 = vpop.f32.mrb[28].mxu1 }
 0x22f   :  { %v1164_v18 = vpop.f32.mrb[29].mxu1 }
 0x230   :  { %v679_v19 = vpop.f32.mrb[30].mxu1 }
 0x231   :  { %v700_v20 = vpack.c.bf16 %v679_v19, %v676_v17  ;;  %v1165_v21 = vpop.f32.mrb[31].mxu1 }
 0x233   :  { %1109 = vmatmul.mubr.msk.bf16.gmra.mrb[28].mxu0 %vm242_vm2, %v700_v20 }
 0x234   :  { %800 = vmatprep.mubr.bf16.mxu0 %v1320_v15 }
 0x236   :  { %v684_v22 = vpop.f32.mrb[32].mxu1 }
 0x237   :  { %v1168_v23 = vpop.f32.mrb[33].mxu1 }
 0x238   :  { %v687_v24 = vpop.f32.mrb[34].mxu1  ;;  %v1608_v23 = vld [vmem:[#allocation6 + $0x50] sm:$0xff] }
 0x239   :  { %v701_v25 = vpack.c.bf16 %v687_v24, %v684_v22  ;;  %v1169_v26 = vpop.f32.mrb[35].mxu1 }
 0x23a   :  { %v1616_v26 = vld [vmem:[#allocation6 + $0x60] sm:$0xff] }
 0x23b   :  { %1110 = vmatmul.mubr.msk.bf16.gmra.mrb[32].mxu0 %vm242_vm2, %v701_v25 }
 0x23c   :  { %810 = vmatprep.mubr.bf16.mxu0 %v1320_v15  ;;  %v1545_v15 = vand.u32 127, %v343_v39 }
 0x23e   :  { %v692_v27 = vpop.f32.mrb[36].mxu1  ;;  %vm356_vm3 = vcmp.lt.s32.totalorder %v1545_v15, 16  ;;  %vm345_vm4 = vcmp.lt.s32.totalorder %v1545_v15, 17  ;;  %vm369_vm5 = vcmp.lt.s32.totalorder %v1545_v15, 15  ;;  %vm382_vm6 = vcmp.lt.s32.totalorder %v1545_v15, 1 }
 0x23f   :  { %v702_v28 = vpack.c.bf16 %v692_v27, %v692_v27  ;;  %v1172_v29 = vpop.f32.mrb[37].mxu1  ;;  %vm397_vm7 = vcmp.lt.s32.totalorder %v1545_v15, 127  ;;  %vm410_vm8 = vcmp.lt.s32.totalorder %v1545_v15, 113  ;;  %vm423_vm9 = vcmp.lt.s32.totalorder %v1545_v15, 112 }
 0x240   :  { %v695_v30 = vpop.f32.mrb[38].mxu1  ;;  %vm436_vm10 = vcmp.lt.s32.totalorder %v1545_v15, 111  ;;  %v1328_v15 = vmov 1966171168  }
 0x241   :  { %v1173_v31 = vpop.f32.mrb[39].mxu1 }
 0x243   :  { %1111 = vmatmul.mubr.msk.bf16.gmra.mrb[36].mxu0 %vm242_vm2, %v702_v28 }
 0x269   :  { %v340_v34 = vpop.permute.xlu0 %339 }
 0x26b   :  { %v353_v33 = vpop.permute.xlu1 %352 }
 0x26d   :  { %v342_v36 = vpop.permute.xlu0 %341 }
 0x26e   :  { %v347_v51 = vsel %vm345_vm4, %v342_v36, %v340_v34  ;;  %v346_v3 = vsel %vm345_vm4, %v340_v34, %v342_v36  ;;  %v1629_v36 = vld [vmem:[#allocation6 + $0x70] sm:$0xff] }
 0x26f   :  { %v355_v35 = vpop.permute.xlu1 %354  ;;  %v350_v61 = vmul.f32 %v1561_v50, %v347_v51  ;;  %v351_v18 = vmul.f32 %v1586_v2, %v346_v3 }
 0x270   :  { %v358_v47 = vsel %vm356_vm3, %v355_v35, %v353_v33  ;;  %v357_v63 = vsel %vm356_vm3, %v353_v33, %v355_v35 }
 0x271   :  { %v366_v38 = vpop.permute.xlu0 %365  ;;  %v361_v55 = vmul.f32 %v1555_v46, %v358_v47  ;;  %v362_v9 = vmul.f32 %v1581_v62, %v357_v63 }
 0x273   :  { %v368_v37 = vpop.permute.xlu1 %367  ;;  %v363_v4 = vadd.f32 %v361_v55, %v350_v61  ;;  %v364_v21 = vadd.f32 %v362_v9, %v351_v18 }
 0x274   :  { %v371_v53 = vsel %vm369_vm5, %v368_v37, %v366_v38  ;;  %v370_v6 = vsel %vm369_vm5, %v366_v38, %v368_v37 }
 0x275   :  { %v379_v41 = vpop.permute.xlu0 %378  ;;  %v374_v0 = vmul.f32 %v1565_v52, %v371_v53  ;;  %v375_v19 = vmul.f32 %v1590_v5, %v370_v6 }
 0x277   :  { %v381_v40 = vpop.permute.xlu1 %380  ;;  %v376_v12 = vadd.f32 %v374_v0, %v363_v4  ;;  %v377_v25 = vadd.f32 %v375_v19, %v364_v21  ;;  %v1661_v4 = vld [vmem:[#allocation6 + $0x88] sm:$0xff] }
 0x278   :  { %v384_v60 = vsel %vm382_vm6, %v381_v40, %v379_v41  ;;  %v383_v14 = vsel %vm382_vm6, %v379_v41, %v381_v40  ;;  %v1633_v40 = vld [vmem:[#allocation6 + $0x58] sm:$0xff] }
 0x279   :  { %v387_v7 = vmul.f32 %v1575_v57, %v384_v60  ;;  %v388_v22 = vmul.f32 %v1598_v13, %v383_v14  ;;  %v1655_v60 = vld [vmem:[#allocation6 + $0x78] sm:$0xff] }
 0x27b   :  { %v1548_v42 = vpop.permute.xlu0 %393  ;;  %v389_v20 = vadd.f32 %v387_v7, %v376_v12  ;;  %v390_v35 = vadd.f32 %v388_v22, %v377_v25 }
 0x27c   :  { %v1552_v44 = vpop.permute.xlu1 %395 }
 0x27d   :  { %v398_v24 = vsel %vm397_vm7, %v1548_v42, %v1552_v44  ;;  %v391_v30 = vadd.f32 %v389_v20, %v1521_v58  ;;  %v399_v58 = vsel %vm397_vm7, %v1552_v44, %v1548_v42  ;;  %v392_v51 = vadd.f32 %v390_v35, %v1523_v59 }
 0x27e   :  { %v402_v31 = vmul.f32 %v1608_v23, %v398_v24  ;;  %v403_v53 = vmul.f32 %v1633_v40, %v399_v58 }
 0x281   :  { %v1569_v54 = vpop.permute.xlu0 %406 }
 0x282   :  { %v1572_v56 = vpop.permute.xlu1 %408 }
 0x283   :  { %v411_v27 = vsel %vm410_vm8, %v1569_v54, %v1572_v56  ;;  %v412_v42 = vsel %vm410_vm8, %v1572_v56, %v1569_v54  ;;  %v405_v56 = vadd.f32 %v403_v53, %v392_v51 }
 0x284   :  { %v415_v41 = vmul.f32 %v1616_v26, %v411_v27 }
 0x285   :  { %v420_v10 = vpop.permute.xlu0 %419 }
 0x286   :  { %v422_v16 = vpop.permute.xlu1 %421 }
 0x287   :  { %v424_v37 = vsel %vm423_vm9, %v420_v10, %v422_v16  ;;  %v425_v61 = vsel %vm423_vm9, %v422_v16, %v420_v10 }
 0x288   :  { %v428_v44 = vmul.f32 %v1629_v36, %v424_v37  ;;  %v429_v6 = vmul.f32 %v1655_v60, %v425_v61 }
 0x289   :  { %v433_v28 = vpop.permute.xlu0 %432 }
 0x28a   :  { %v435_v33 = vpop.permute.xlu1 %434 }
 0x28b   :  { %v437_v47 = vsel %vm436_vm10, %v433_v28, %v435_v33  ;;  %v438_v54 = vsel %vm436_vm10, %v435_v33, %v433_v28 }
 0x2f6   :  { %v772_v43 = vpop.f32.mrb[20].mxu0 }
 0x2f7   :  { %819 = vrot.lane.b32.xlu0 %v772_v43, %s1321_s5  ;;  %v774_v45 = vpop.f32.mrb[21].mxu0 }
 0x2f8   :  { %821 = vrot.lane.b32.xlu1 %v774_v45, %s1321_s5  ;;  %v776_v48 = vpop.f32.mrb[22].mxu0  ;;  %v1641_v45 = vld [vmem:[#allocation6 + $0x80] sm:$0xff] }
 0x2f9   :  { %v778_v49 = vpop.f32.mrb[23].mxu0  ;;  %v441_v63 = vmul.f32 %v1641_v45, %v437_v47 }
 0x2fb   :  { %829 = vrot.lane.b32.xlu0 %v776_v48, %s1313_s13  ;;  %v404_v48 = vadd.f32 %v402_v31, %v391_v30 }
 0x2fc   :  { %831 = vrot.lane.b32.xlu1 %v778_v49, %s1313_s13  ;;  %v1646_v49 = vld [vmem:[#allocation6 + $0x68] sm:$0xff] }
 0x2fd   :  { %v417_v55 = vadd.f32 %v415_v41, %v404_v48  ;;  %v416_v0 = vmul.f32 %v1646_v49, %v412_v42 }
 0x2fe   :  { %v782_v1 = vpop.f32.mrb[24].mxu0 }
 0x2ff   :  { %841 = vrot.lane.b32.xlu0 %v782_v1, %s1322_s12  ;;  %v784_v8 = vpop.f32.mrb[25].mxu0  ;;  %v430_v3 = vadd.f32 %v428_v44, %v417_v55  ;;  %v418_v10 = vadd.f32 %v416_v0, %v405_v56 }
 0x300   :  { %843 = vrot.lane.b32.xlu1 %v784_v8, %s1322_s12  ;;  %v786_v11 = vpop.f32.mrb[26].mxu0 }
 0x301   :  { %v788_v17 = vpop.f32.mrb[27].mxu0  ;;  %v443_v8 = vadd.f32 %v441_v63, %v430_v3  ;;  %v431_v12 = vadd.f32 %v429_v6, %v418_v10 }
 0x303   :  { %853 = vrot.lane.b32.xlu0 %v786_v11, %s1323_s0  ;;  %v442_v11 = vmul.f32 %v1661_v4, %v438_v54  ;;  %v450_v14 = vadd.f32 %v1542_v32, %v443_v8 }
 0x304   :  { %855 = vrot.lane.b32.xlu1 %v788_v17, %s1323_s0 }
 0x305   :  { %v444_v16 = vadd.f32 %v442_v11, %v431_v12  ;;  %v1673_v20 = vmax.f32 %v450_v14, 0.0 }
 0x306   :  { %v1622_v29 = vpop.f32.mrb[28].mxu0 }
 0x307   :  { %v1627_v34 = vpop.f32.mrb[29].mxu0  ;;  %v451_v22 = vadd.f32 %v1542_v32, %v444_v16 }
 0x308   :  { %v796_v38 = vpop.f32.mrb[30].mxu0 }
 0x309   :  { %867 = vrot.lane.b32.xlu0 %v796_v38, %s1324_s18  ;;  %v798_v43 = vpop.f32.mrb[31].mxu0  ;;  %v1679_v24 = vmax.f32 %v451_v22, 0.0 }
 0x30a   :  { %869 = vrot.lane.b32.xlu1 %v798_v43, %s1324_s18 }
 0x30e   :  { %v802_v1 = vpop.f32.mrb[32].mxu0 }
 0x30f   :  { %879 = vrot.lane.b32.xlu0 %v802_v1, %s1325_s19  ;;  %v804_v59 = vpop.f32.mrb[33].mxu0 }
 0x310   :  { %881 = vrot.lane.b32.xlu1 %v804_v59, %s1325_s19  ;;  %v806_v7 = vpop.f32.mrb[34].mxu0 }
 0x311   :  { %v808_v9 = vpop.f32.mrb[35].mxu0 }
 0x314   :  { %891 = vrot.lane.b32.xlu1 %v806_v7, %s1326_s20 }
 0x316   :  { %v812_v17 = vpop.f32.mrb[36].mxu0 }
 0x317   :  { %903 = vrot.lane.b32.xlu0 %v812_v17, %s1327_s21  ;;  %v814_v18 = vpop.f32.mrb[37].mxu0 }
 0x318   :  { %893 = vrot.lane.b32.xlu1 %v808_v9, %s1326_s20  ;;  %v816_v19 = vpop.f32.mrb[38].mxu0 }
 0x319   :  { %v817_v21 = vpop.f32.mrb[39].mxu0 }
 0x31b   :  { %454 = vrot.lane.b32.xlu0 %v1673_v20, %s1321_s5 }
 0x31c   :  { %905 = vrot.lane.b32.xlu1 %v814_v18, %s1327_s21 }
 0x31f   :  { %464 = vrot.lane.b32.xlu0 %v1673_v20, %s1313_s13 }
 0x320   :  { %456 = vrot.lane.b32.xlu1 %v1679_v24, %s1321_s5 }
 0x323   :  { %476 = vrot.lane.b32.xlu0 %v1673_v20, %s1322_s12 }
 0x324   :  { %466 = vrot.lane.b32.xlu1 %v1679_v24, %s1313_s13 }
 0x327   :  { %488 = vrot.lane.b32.xlu0 %v1673_v20, %s1323_s0 }
 0x328   :  { %478 = vrot.lane.b32.xlu1 %v1679_v24, %s1322_s12 }
 0x32b   :  { %506 = vrot.lane.b32.xlu0 %v1673_v20, %s1324_s18 }
 0x32c   :  { %490 = vrot.lane.b32.xlu1 %v1679_v24, %s1323_s0 }
 0x32f   :  { %518 = vrot.lane.b32.xlu0 %v1673_v20, %s1325_s19 }
 0x330   :  { %508 = vrot.lane.b32.xlu1 %v1679_v24, %s1324_s18 }
 0x333   :  { %530 = vrot.lane.b32.xlu0 %v1673_v20, %s1326_s20 }
 0x334   :  { %520 = vrot.lane.b32.xlu1 %v1679_v24, %s1325_s19 }
 0x337   :  { %542 = vrot.lane.b32.xlu0 %v1673_v20, %s1327_s21 }
 0x338   :  { %532 = vrot.lane.b32.xlu1 %v1679_v24, %s1326_s20 }
 0x33c   :  { %544 = vrot.lane.b32.xlu1 %v1679_v24, %s1327_s21 }
 0x369   :  { %v820_v25 = vpop.permute.xlu0 %819 }
 0x36a   :  { %v822_v27 = vpop.permute.xlu1 %821 }
 0x36b   :  { %v823_v41 = vsel %vm345_vm4, %v820_v25, %v822_v27  ;;  %v824_v43 = vsel %vm345_vm4, %v822_v27, %v820_v25 }
 0x36c   :  { %v827_v61 = vmul.f32 %v824_v43, %v1561_v50  ;;  %v828_v63 = vmul.f32 %v823_v41, %v1586_v2 }
 0x36d   :  { %v830_v30 = vpop.permute.xlu0 %829 }
 0x36e   :  { %v832_v28 = vpop.permute.xlu1 %831 }
 0x36f   :  { %v833_v37 = vsel %vm356_vm3, %v830_v30, %v832_v28  ;;  %v834_v38 = vsel %vm356_vm3, %v832_v28, %v830_v30 }
 0x370   :  { %v837_v42 = vmul.f32 %v834_v38, %v1555_v46  ;;  %v838_v44 = vmul.f32 %v833_v37, %v1581_v62 }
 0x371   :  { %v842_v33 = vpop.permute.xlu0 %841 }
 0x372   :  { %v844_v31 = vpop.permute.xlu1 %843  ;;  %v839_v54 = vadd.f32 %v837_v42, %v827_v61  ;;  %v840_v46 = vadd.f32 %v838_v44, %v828_v63 }
 0x373   :  { %v845_v47 = vsel %vm369_vm5, %v842_v33, %v844_v31  ;;  %v846_v48 = vsel %vm369_vm5, %v844_v31, %v842_v33 }
 0x374   :  { %v849_v0 = vmul.f32 %v846_v48, %v1565_v52  ;;  %v850_v1 = vmul.f32 %v845_v47, %v1590_v5 }
 0x375   :  { %v854_v58 = vpop.permute.xlu0 %853 }
 0x376   :  { %v856_v35 = vpop.permute.xlu1 %855  ;;  %v851_v6 = vadd.f32 %v849_v0, %v839_v54  ;;  %v852_v7 = vadd.f32 %v850_v1, %v840_v46  ;;  %v471_v54 = vld [vmem:[#allocation8 + $0x18] sm:$0xff] }
 0x377   :  { %v857_v53 = vsel %vm382_vm6, %v854_v58, %v856_v35  ;;  %v858_v55 = vsel %vm382_vm6, %v856_v35, %v854_v58 }
 0x378   :  { %v861_v62 = vmul.f32 %v858_v55, %v1575_v57  ;;  %v862_v59 = vmul.f32 %v857_v53, %v1598_v13 }
 0x37a   :  { %v863_v52 = vadd.f32 %v861_v62, %v851_v6  ;;  %v864_v9 = vadd.f32 %v862_v59, %v852_v7  ;;  %v1807_v59 = vld [vmem:[#allocation8] sm:$0xff] }
 0x37b   :  { %v868_v3 = vpop.permute.xlu0 %867 }
 0x37c   :  { %v870_v51 = vpop.permute.xlu1 %869  ;;  %v865_v12 = vadd.f32 %v863_v52, %v1622_v29  ;;  %v866_v14 = vadd.f32 %v864_v9, %v1627_v34 }
 0x37d   :  { %v871_v50 = vsel %vm397_vm7, %v868_v3, %v870_v51  ;;  %v872_v2 = vsel %vm397_vm7, %v870_v51, %v868_v3  ;;  %v470_v3 = vld [vmem:[#allocation8 + $0x10] sm:$0xff] }
 0x37e   :  { %v875_v13 = vmul.f32 %v871_v50, %v1608_v23  ;;  %v876_v11 = vmul.f32 %v872_v2, %v1633_v40  ;;  %v1817_v50 = vld [vmem:[#allocation8 + $0x28] sm:$0xff] }
 0x380   :  { %v877_v22 = vadd.f32 %v875_v13, %v865_v12  ;;  %v878_v25 = vadd.f32 %v876_v11, %v866_v14  ;;  %v1827_v13 = vld [vmem:[#allocation8 + $0x30] sm:$0xff]  ;;  %v1829_v11 = vld [vmem:[#allocation8 + $0x38] sm:$0xff] }
 0x381   :  { %v880_v8 = vpop.permute.xlu0 %879 }
 0x382   :  { %v882_v56 = vpop.permute.xlu1 %881 }
 0x383   :  { %v883_v10 = vsel %vm410_vm8, %v880_v8, %v882_v56  ;;  %v884_v57 = vsel %vm410_vm8, %v882_v56, %v880_v8  ;;  %v1809_v56 = vld [vmem:[#allocation8 + $0x8] sm:$0xff]  ;;  %v1815_v8 = vld [vmem:[#allocation8 + $0x20] sm:$0xff] }
 0x384   :  { %v887_v16 = vmul.f32 %v883_v10, %v1616_v26  ;;  %v888_v17 = vmul.f32 %v884_v57, %v1646_v49 }
 0x386   :  { %v892_v5 = vpop.permute.xlu1 %891  ;;  %v889_v29 = vadd.f32 %v887_v16, %v877_v22  ;;  %v890_v27 = vadd.f32 %v888_v17, %v878_v25 }
 0x389   :  { %v904_v34 = vpop.permute.xlu0 %903 }
 0x38a   :  { %v894_v18 = vpop.permute.xlu1 %893 }
 0x38b   :  { %v895_v19 = vsel %vm423_vm9, %v892_v5, %v894_v18  ;;  %v896_v21 = vsel %vm423_vm9, %v894_v18, %v892_v5 }
 0x38c   :  { %v899_v23 = vmul.f32 %v895_v19, %v1629_v36  ;;  %v900_v40 = vmul.f32 %v896_v21, %v1655_v60 }
 0x38e   :  { %v906_v28 = vpop.permute.xlu1 %905  ;;  %v901_v30 = vadd.f32 %v899_v23, %v889_v29  ;;  %v902_v31 = vadd.f32 %v900_v40, %v890_v27 }
 0x38f   :  { %v907_v26 = vsel %vm436_vm10, %v904_v34, %v906_v28  ;;  %v908_v49 = vsel %vm436_vm10, %v906_v28, %v904_v34  ;;  %v1841_v28 = vld [vmem:[#allocation8 + $0x40] sm:$0xff] }
 0x390   :  { %v911_v33 = vmul.f32 %v907_v26, %v1641_v45  ;;  %v912_v35 = vmul.f32 %v908_v49, %v1661_v4  ;;  %v455_v45 = vpop.permute.xlu0 %454  ;;  %v1843_v26 = vld [vmem:[#allocation8 + $0x48] sm:$0xff] }
 0x392   :  { %v913_v37 = vadd.f32 %v911_v33, %v901_v30  ;;  %v914_v36 = vadd.f32 %v912_v35, %v902_v31  ;;  %v457_v4 = vpop.permute.xlu1 %456  ;;  %v502_v35 = vmul.f32 %v1841_v28, %v1673_v20 }
 0x393   :  { %v458_v6 = vsel %vm345_vm4, %v455_v45, %v457_v4  ;;  %v459_v7 = vsel %vm345_vm4, %v457_v4, %v455_v45 }
 0x394   :  { %v915_v60 = vadd.f32 %v913_v37, %v1542_v32  ;;  %v916_v38 = vadd.f32 %v914_v36, %v1542_v32  ;;  %v81_v32 = vld [vmem:[#allocation2] sm:$0x1]  ;;  %v465_v43 = vpop.permute.xlu0 %464  ;;  %v462_v16 = vmul.f32 %v1807_v59, %v459_v7  ;;  %v463_v17 = vmul.f32 %v1809_v56, %v458_v6  ;;  %v1849_v36 = vld [vmem:[#allocation8 + $0x50] sm:$0xff] }
 0x395   :  { %v503_v37 = vmul.f32 %v1843_v26, %v1679_v24 }
 0x396   :  { %v1763_v58 = vmax.f32 %v915_v60, 0.0  ;;  %v1765_v41 = vmax.f32 %v916_v38, 0.0  ;;  %v467_v47 = vpop.permute.xlu1 %466  ;;  %v1851_v60 = vld [vmem:[#allocation8 + $0x58] sm:$0xff] }
 0x397   :  { %v468_v46 = vsel %vm356_vm3, %v465_v43, %v467_v47  ;;  %v469_v62 = vsel %vm356_vm3, %v467_v47, %v465_v43 }
 0x398   :  { %921 = vrot.lane.b32.xlu1 %v1765_v41, %s1321_s5  ;;  %919 = vrot.lane.b32.xlu0 %v1763_v58, %s1321_s5  ;;  %v477_v48 = vpop.permute.xlu0 %476  ;;  %v472_v10 = vmul.f32 %v470_v3, %v469_v62  ;;  %v473_v57 = vmul.f32 %v471_v54, %v468_v46 }
 0x39a   :  { %v479_v42 = vpop.permute.xlu1 %478  ;;  %v474_v25 = vadd.f32 %v472_v10, %v462_v16  ;;  %v475_v23 = vadd.f32 %v473_v57, %v463_v17  ;;  %v537_v16 = vld [vmem:[#allocation8 + $0x78] sm:$0xff] }
 0x39b   :  { %v480_v2 = vsel %vm369_vm5, %v477_v48, %v479_v42  ;;  %v481_v52 = vsel %vm369_vm5, %v479_v42, %v477_v48  ;;  %v1861_v48 = vld [vmem:[#allocation8 + $0x60] sm:$0xff]  ;;  %v1863_v42 = vld [vmem:[#allocation8 + $0x68] sm:$0xff] }
 0x39c   :  { %931 = vrot.lane.b32.xlu1 %v1765_v41, %s1313_s13  ;;  %929 = vrot.lane.b32.xlu0 %v1763_v58, %s1313_s13  ;;  %v489_v44 = vpop.permute.xlu0 %488  ;;  %v484_v18 = vmul.f32 %v1815_v8, %v481_v52  ;;  %v485_v19 = vmul.f32 %v1817_v50, %v480_v2  ;;  %s1329_s13 = smov [#allocation9]  }
 0x39d   :  { %s1058_s22 = sshll.u32 %s1329_s13, 4  ;;  %s1059_s22 = int_to_ptr.vmem [resolvable:$true] %s1058_s22 }
 0x39e   :  { %v491_v51 = vpop.permute.xlu1 %490  ;;  %v486_v27 = vadd.f32 %v484_v18, %v474_v25  ;;  %v487_v34 = vadd.f32 %v485_v19, %v475_v23  ;;  %s1283_s23 = scalar_lea.vmem %s1059_s22, 64  ;;  %p1288_p11 = scmp.lt.s32.totalorder %s1059_s22, %s1059_s22 }
 0x39f   :  { %v492_v12 = vsel %vm382_vm6, %v489_v44, %v491_v51  ;;  %v493_v14 = vsel %vm382_vm6, %v491_v51, %v489_v44  ;;  %p1284_p10 = scmp.ne.s32.totalorder %s1059_s22, %s1283_s23  ;;  %p1289_p12 = scmp.lt.s32.totalorder %s1283_s23, %s1283_s23 }
 0x3a0   :  { %943 = vrot.lane.b32.xlu1 %v1765_v41, %s1322_s12  ;;  %941 = vrot.lane.b32.xlu0 %v1763_v58, %s1322_s12  ;;  %v507_v53 = vpop.permute.xlu0 %506  ;;  %v496_v40 = vmul.f32 %v1827_v13, %v493_v14  ;;  %v497_v29 = vmul.f32 %v1829_v11, %v492_v12  ;;  %v536_v14 = vld [vmem:[#allocation8 + $0x70] sm:$0xff] }
 0x3a1   :  { %p1290_p13 = por %p1289_p12, %p1288_p11 }
 0x3a2   :  { %v509_v55 = vpop.permute.xlu1 %508  ;;  %v498_v31 = vadd.f32 %v496_v40, %v486_v27  ;;  %v499_v33 = vadd.f32 %v497_v29, %v487_v34 }
 0x3a3   :  { %v510_v38 = vsel %vm397_vm7, %v507_v53, %v509_v55  ;;  %p1291_p0 = pnand %p1290_p13, %p1284_p10 }
 0x3a4   :  { %955 = vrot.lane.b32.xlu1 %v1765_v41, %s1323_s0  ;;  %953 = vrot.lane.b32.xlu0 %v1763_v58, %s1323_s0  ;;  %v519_v61 = vpop.permute.xlu0 %518  ;;  %v504_v47 = vadd.f32 %v502_v35, %v498_v31  ;;  %v505_v24 = vadd.f32 %v503_v37, %v499_v33  ;;  %v514_v6 = vmul.f32 %v1849_v36, %v510_v38 }
 0x3a6   :  { %v521_v63 = vpop.permute.xlu1 %520  ;;  %v516_v40 = vadd.f32 %v514_v6, %v504_v47  ;;  %v968_v47 = vmul.f32 %v1765_v41, %v1843_v26 }
 0x3a7   :  { %v522_v44 = vsel %vm410_vm8, %v519_v61, %v521_v63  ;;  %v523_v51 = vsel %vm410_vm8, %v521_v63, %v519_v61 }
 0x3a8   :  { %973 = vrot.lane.b32.xlu1 %v1765_v41, %s1324_s18  ;;  %971 = vrot.lane.b32.xlu0 %v1763_v58, %s1324_s18  ;;  %v1799_v0 = vpop.permute.xlu0 %530  ;;  %v526_v61 = vmul.f32 %v1861_v48, %v522_v44  ;;  %v527_v63 = vmul.f32 %v1863_v42, %v523_v51 }
 0x3aa   :  { %v1801_v1 = vpop.permute.xlu1 %532  ;;  %v528_v31 = vadd.f32 %v526_v61, %v516_v40 }
 0x3ab   :  { %v534_v10 = vsel %vm423_vm9, %v1799_v0, %v1801_v1  ;;  %v535_v57 = vsel %vm423_vm9, %v1801_v1, %v1799_v0 }
 0x3ac   :  { %985 = vrot.lane.b32.xlu1 %v1765_v41, %s1325_s19  ;;  %983 = vrot.lane.b32.xlu0 %v1763_v58, %s1325_s19  ;;  %v1823_v9 = vpop.permute.xlu0 %542  ;;  %v538_v27 = vmul.f32 %v536_v14, %v534_v10  ;;  %v539_v34 = vmul.f32 %v537_v16, %v535_v57 }
 0x3ae   :  { %v1825_v5 = vpop.permute.xlu1 %544 }
 0x3af   :  { %v547_v0 = vsel %vm436_vm10, %v1825_v5, %v1823_v9 }
 0x3b0   :  { %997 = vrot.lane.b32.xlu1 %v1765_v41, %s1326_s20  ;;  %995 = vrot.lane.b32.xlu0 %v1763_v58, %s1326_s20 }
 0x3b4   :  { %1009 = vrot.lane.b32.xlu1 %v1765_v41, %s1327_s21  ;;  %1007 = vrot.lane.b32.xlu0 %v1763_v58, %s1327_s21 }
 0x3b8   :  { %568 = vperm.xlu0 %1195, %v81_v32   ;;  %v511_v32 = vsel %vm397_vm7, %v509_v55, %v507_v53 }
 0x3b9   :  { %v515_v7 = vmul.f32 %v1851_v60, %v511_v32 }
 0x3bb   :  { %v517_v29 = vadd.f32 %v515_v7, %v505_v24 }
 0x3bd   :  { %v529_v33 = vadd.f32 %v527_v63, %v517_v29 }
 0x40a   :  { %v920_v21 = vpop.permute.xlu0 %919  ;;  %v922_v22 = vpop.permute.xlu1 %921 }
 0x40b   :  { %v923_v53 = vsel %vm345_vm4, %v920_v21, %v922_v22  ;;  %v924_v55 = vsel %vm345_vm4, %v922_v22, %v920_v21  ;;  %v546_v21 = vsel %vm436_vm10, %v1823_v9, %v1825_v5 }
 0x40e   :  { %v930_v49 = vpop.permute.xlu0 %929  ;;  %v932_v30 = vpop.permute.xlu1 %931 }
 0x40f   :  { %v933_v45 = vsel %vm356_vm3, %v930_v49, %v932_v30  ;;  %v934_v4 = vsel %vm356_vm3, %v932_v30, %v930_v49 }
 0x410   :  { %v937_v2 = vmul.f32 %v934_v4, %v470_v3  ;;  %v938_v52 = vmul.f32 %v933_v45, %v471_v54  ;;  %v927_v3 = vmul.f32 %v924_v55, %v1807_v59  ;;  %v928_v54 = vmul.f32 %v923_v53, %v1809_v56  ;;  %v548_v56 = vld [vmem:[#allocation8 + $0x80] sm:$0xff] }
 0x411   :  { %v550_v35 = vmul.f32 %v548_v56, %v546_v21  ;;  %v540_v45 = vadd.f32 %v538_v27, %v528_v31  ;;  %v541_v4 = vadd.f32 %v539_v34, %v529_v33 }
 0x412   :  { %v942_v20 = vpop.permute.xlu0 %941  ;;  %v944_v43 = vpop.permute.xlu1 %943  ;;  %v940_v22 = vadd.f32 %v938_v52, %v928_v54 }
 0x413   :  { %v945_v46 = vsel %vm369_vm5, %v942_v20, %v944_v43  ;;  %v946_v62 = vsel %vm369_vm5, %v944_v43, %v942_v20  ;;  %v967_v43 = vmul.f32 %v1763_v58, %v1841_v28  ;;  %v552_v44 = vadd.f32 %v550_v35, %v540_v45 }
 0x414   :  { %v949_v17 = vmul.f32 %v946_v62, %v1815_v8  ;;  %v950_v18 = vmul.f32 %v945_v46, %v1817_v50  ;;  %v549_v8 = vld [vmem:[#allocation8 + $0x88] sm:$0xff]  ;;  %v939_v50 = vadd.f32 %v937_v2, %v927_v3 }
 0x415   :  { %v551_v37 = vmul.f32 %v549_v8, %v547_v0  ;;  %v554_v26 = vrot.slane %v552_v44, 4 }
 0x416   :  { %v956_v12 = vpop.permute.xlu1 %955  ;;  %v954_v19 = vpop.permute.xlu0 %953  ;;  %v951_v9 = vadd.f32 %v949_v17, %v939_v50  ;;  %v952_v5 = vadd.f32 %v950_v18, %v940_v22 }
 0x417   :  { %v957_v1 = vsel %vm382_vm6, %v954_v19, %v956_v12  ;;  %v958_v59 = vsel %vm382_vm6, %v956_v12, %v954_v19  ;;  %v553_v51 = vadd.f32 %v551_v37, %v541_v4 }
 0x418   :  { %v961_v25 = vmul.f32 %v958_v59, %v1827_v13  ;;  %v962_v23 = vmul.f32 %v957_v1, %v1829_v11 }
 0x419   :  { %v560_v52 = vrot.slane %v553_v51, 4 }
 0x41a   :  { %v974_v49 = vpop.permute.xlu1 %973  ;;  %v972_v30 = vpop.permute.xlu0 %971  ;;  %v963_v38 = vadd.f32 %v961_v25, %v951_v9  ;;  %v964_v32 = vadd.f32 %v962_v23, %v952_v5  ;;  %v572_v5 = vshrl.u32 %v343_v39, 7 }
 0x41b   :  { %v975_v13 = vsel %vm397_vm7, %v972_v30, %v974_v49  ;;  %v976_v11 = vsel %vm397_vm7, %v974_v49, %v972_v30  ;;  %v561_v18 = vadd.f32 %v560_v52, %v553_v51  ;;  %v581_v30 = vunpack.c.l.s4 %v1328_v15 }
 0x41c   :  { %v969_v46 = vadd.f32 %v967_v43, %v963_v38  ;;  %v970_v62 = vadd.f32 %v968_v47, %v964_v32  ;;  %v979_v6 = vmul.f32 %v975_v13, %v1849_v36  ;;  %v980_v7 = vmul.f32 %v976_v11, %v1851_v60 }
 0x41d   :  { %v573_v38 = vsub.s32 0, %v572_v5  ;;  %v582_v32 = vunpack.c.0.s8 %v581_v30 }
 0x41e   :  { %v986_v20 = vpop.permute.xlu1 %985  ;;  %v984_v24 = vpop.permute.xlu0 %983  ;;  %v981_v10 = vadd.f32 %v979_v6, %v969_v46  ;;  %v982_v57 = vadd.f32 %v980_v7, %v970_v62 }
 0x41f   :  { %v987_v53 = vsel %vm410_vm8, %v984_v24, %v986_v20  ;;  %v988_v55 = vsel %vm410_vm8, %v986_v20, %v984_v24  ;;  %v585_v47 = vsub.s32 %v582_v32, %v572_v5 }
 0x420   :  { %v991_v58 = vmul.f32 %v987_v53, %v1861_v48  ;;  %v992_v41 = vmul.f32 %v988_v55, %v1863_v42  ;;  %v555_v48 = vadd.f32 %v554_v26, %v552_v44 }
 0x422   :  { %v998_v2 = vpop.permute.xlu1 %997  ;;  %v996_v28 = vpop.permute.xlu0 %995  ;;  %v993_v60 = vadd.f32 %v991_v58, %v981_v10  ;;  %v994_v54 = vadd.f32 %v992_v41, %v982_v57 }
 0x423   :  { %v999_v61 = vsel %vm423_vm9, %v996_v28, %v998_v2  ;;  %v1000_v63 = vsel %vm423_vm9, %v998_v2, %v996_v28 }
 0x424   :  { %v1003_v12 = vmul.f32 %v999_v61, %v536_v14  ;;  %v1004_v36 = vmul.f32 %v1000_v63, %v537_v16  ;;  %v556_v14 = vrot.slane %v555_v48, 2  ;;  %v562_v16 = vrot.slane %v561_v18, 2 }
 0x426   :  { %v1010_v3 = vpop.permute.xlu1 %1009  ;;  %v1008_v17 = vpop.permute.xlu0 %1007  ;;  %v1005_v21 = vadd.f32 %v1003_v12, %v993_v60  ;;  %v1006_v0 = vadd.f32 %v1004_v36, %v994_v54  ;;  %v557_v27 = vadd.f32 %v556_v14, %v555_v48  ;;  %v563_v34 = vadd.f32 %v562_v16, %v561_v18 }
 0x427   :  { %v1011_v42 = vsel %vm436_vm10, %v1008_v17, %v1010_v3  ;;  %v1012_v19 = vsel %vm436_vm10, %v1010_v3, %v1008_v17 }
 0x428   :  { %v1015_v1 = vmul.f32 %v1011_v42, %v548_v56  ;;  %v1016_v59 = vmul.f32 %v1012_v19, %v549_v8  ;;  %v558_v56 = vrot.slane %v557_v27, 1  ;;  %v564_v8 = vrot.slane %v563_v34, 1 }
 0x42a   :  { %v1017_v50 = vadd.f32 %v1015_v1, %v1005_v21  ;;  %v1018_v22 = vadd.f32 %v1016_v59, %v1006_v0  ;;  %v559_v4 = vadd.f32 %v558_v56, %v557_v27  ;;  %v565_v13 = vadd.f32 %v564_v8, %v563_v34 }
 0x42c   :  { %v1019_v25 = vrot.slane %v1017_v50, 4  ;;  %v1025_v23 = vrot.slane %v1018_v22, 4 }
 0x42e   :  { %v1020_v40 = vadd.f32 %v1019_v25, %v1017_v50  ;;  %v1026_v29 = vadd.f32 %v1025_v23, %v1018_v22 }
 0x430   :  { %v1021_v49 = vrot.slane %v1020_v40, 2  ;;  %v1027_v9 = vrot.slane %v1026_v29, 2 }
 0x432   :  { %v1022_v31 = vadd.f32 %v1021_v49, %v1020_v40  ;;  %v1028_v33 = vadd.f32 %v1027_v9, %v1026_v29 }
 0x434   :  { %v1023_v35 = vrot.slane %v1022_v31, 1  ;;  %v1029_v37 = vrot.slane %v1028_v33, 1 }
 0x436   :  { %v1024_v20 = vadd.f32 %v1023_v35, %v1022_v31  ;;  %v1030_v43 = vadd.f32 %v1029_v37, %v1028_v33 }
 0x437   :  { %v569_v45 = vpop.permute.xlu0 %568 }
 0x438   :  { %v574_v11 = vrot.slane %v569_v45, %v573_v38 }
 0x43a   :  { %v575_v24 = vadd.f32 %v574_v11, %v559_v4  ;;  %v576_v44 = vadd.f32 %v574_v11, %v565_v13  ;;  %v1031_v51 = vadd.f32 %v1024_v20, %v574_v11  ;;  %v1032_v53 = vadd.f32 %v1030_v43, %v574_v11 }
 0x43c   :  { %v579_v55 = vcombine.low %v575_v24, %v576_v44  ;;  %v1035_v46 = vcombine.low %v1031_v51, %v1032_v53 }
 0x43e   :  { %v586_v62 = vrot.slane %v579_v55, %v585_v47  ;;  %v1042_v6 = vrot.slane %v1035_v46, %v585_v47 }
 0x440   :  { %v593_v7 = vrot.slane %v586_v62, %v585_v47  ;;  %v1049_v2 = vrot.slane %v1042_v6, %v585_v47 }
 0x442   :  { %599 = vst.msk [vmem:[#allocation9] sm:$0x3] %vm597_vm11, %v593_v7  ;;  %1052 = vst.msk [vmem:[#allocation9 + $0x2] sm:$0x3] %vm597_vm11, %v1049_v2 }
 0x443   :  { %1294 = shalt.err (!%p1291_p0)
}
 0x444   :  { %s1295_s4 = scalar_lea.hbm %s1952_s7, 64 }
 0x445   :  { %p1296_p1 = scmp.ne.s32.totalorder %s1952_s7, %s1295_s4  ;;  %p1299_p2 = scmp.lt.u32.totalorder %s1295_s4, %s1952_s7 }
 0x447   :  { %p1301_p3 = pnand %p1299_p2, %p1296_p1 }
 0x449   :  { %1304 = shalt.err (!%p1301_p3)
}
 0x44a   :  { %s1330_s30 = smov 32   ;;  %s1331_s8 = smov 2  }
 0x44b   :  { %1064 = dma.vmem_to_hbm [thread:$0]  %s1059_s22, 64, %s1952_s7, [#allocation5], %s1330_s30, %s1330_s30, %s1331_s8  }
 0x44c   :  { %1309 = dma.done.wait [#allocation5], 64  }
 0x44d   :  { %1310 = vsyncadd [#allocation5], 4294967232 }
 0x44e   :  { %1068 = vsyncpa [#allocation4], 1 }
 0x44f   :  { %1069 = vsyncpa [#allocation7], 1 }
 0x450   :  { %1070 = vsyncpa [#allocation5], 1 }

</bundles_post_ra>
